<compile_context>
chip_gen: v7x
topology: tpu7x:2x2x1
jax: 0.10.0
libtpu: 0.0.40
codegen_flags: <defaults>
</compile_context>

<pallas_src>
import jax
import jax.numpy as jnp
from jax.experimental import pallas as pl
from jax.experimental.pallas import tpu as pltpu


def node_graph_kernel(node_state_ref, act_w_ref, u_ref, aw_out_ref, mask_out_ref):
    """One tile of nodes.

    node_state_ref: (tile_n, B, D)  native dtype (f32 or bf16)
    act_w_ref:      (tile_n, 1, D)  f32  (nodes_act_weight with the trailing 1 folded away)
    u_ref:          (B, tile_n)     f32  uniforms, already in the lane-dense output layout
    aw_out_ref:     (B, tile_n)     f32
    mask_out_ref:   (B, tile_n)     int8
    """
    ns = node_state_ref[...].astype(jnp.float32)   # upcast AFTER the (possibly narrow) DMA
    w = act_w_ref[...].astype(jnp.float32)

    # Per-node dot product over D: VPU multiply + reduce. Deliberately NOT an MXU matmul
    # (1-wide output per node -> <1% MXU utilization; kernel is HBM-bandwidth bound, so
    # the VPU/XLU work sits off the critical path).
    logits = jnp.sum(ns * w, axis=-1)              # (tile_n, B)

    act_weight = jax.nn.sigmoid(logits).T          # (B, tile_n): lane-dense stores
    aw_out_ref[...] = act_weight
    mask_out_ref[...] = (act_weight > u_ref[...]).astype(jnp.int8)


def _choose_tile_n(n_nodes, batch, d_model, itemsize, vmem_tile_budget=4 * 1024 * 1024):
    """Largest node tile that (a) divides n_nodes, (b) is a multiple of 128 (so the
    lane-dense output block's last dim is aligned), and (c) keeps the node_state tile
    within ~4 MiB so double buffering fits comfortably on every generation (incl. v7x)."""
    bytes_per_node = batch * d_model * itemsize
    candidates = [t for t in range(128, n_nodes, 128) if n_nodes % t == 0]
    fitting = [t for t in candidates if t * bytes_per_node <= vmem_tile_budget]
    if fitting:
        return max(fitting)
    if candidates:
        return min(candidates)
    # No multiple-of-128 divisor: fall back to a single block over all nodes.
    # TODO(synk): pad n_nodes to a multiple of 128 for large graphs with awkward sizes.
    return n_nodes


def node_graph_forward(params, state, input_ids, labels, rng_key):
    """Mirrors NodeGraph.forward. input_ids / labels are unused (as in the module).

    Returns (loss, logits, act_weight, act_mask); loss and logits are None, matching the
    torch module's CausalLMOutput(loss=None, logits=None)."""
    node_state, node_exhaustion, input_pred = state
    del node_exhaustion, input_pred, input_ids, labels

    n_nodes, batch, d_model = node_state.shape

    # (N, D, 1) -> (N, 1, D) is a pure reshape (trailing dim is 1): no transpose copy.
    act_w = params["nodes_act_weight"].reshape(n_nodes, 1, d_model).astype(jnp.float32)

    # Fresh uniforms per call (torch.empty_like(act_weight).uniform_()), generated
    # directly in the lane-dense (batch, n_nodes) layout the kernel stores in.
    u = jax.random.uniform(rng_key, (batch, n_nodes), dtype=jnp.float32)

    in_bytes = jnp.dtype(node_state.dtype).itemsize
    tile_n = _choose_tile_n(n_nodes, batch, d_model, in_bytes)
    grid = (n_nodes // tile_n,)

    cost = pl.CostEstimate(
        flops=2 * n_nodes * batch * d_model,
        transcendentals=n_nodes * batch,
        bytes_accessed=(
            n_nodes * batch * d_model * in_bytes      # node_state read (dominant)
            + n_nodes * d_model * 4                   # act weights read
            + n_nodes * batch * 4                     # uniforms read
            + n_nodes * batch * (4 + 1)               # act_weight (f32) + mask (i8) write
        ),
    )

    aw_bn, mask_bn = pl.pallas_call(
        node_graph_kernel,
        out_shape=(
            jax.ShapeDtypeStruct((batch, n_nodes), jnp.float32),
            jax.ShapeDtypeStruct((batch, n_nodes), jnp.int8),
        ),
        grid=grid,
        in_specs=[
            pl.BlockSpec((tile_n, batch, d_model), lambda i: (i, 0, 0)),   # node_state
            pl.BlockSpec((tile_n, 1, d_model), lambda i: (i, 0, 0)),       # act weight
            pl.BlockSpec((batch, tile_n), lambda i: (0, i)),               # uniforms
        ],
        out_specs=(
            pl.BlockSpec((batch, tile_n), lambda i: (0, i)),               # act_weight
            pl.BlockSpec((batch, tile_n), lambda i: (0, i)),               # act_mask
        ),
        compiler_params=pltpu.CompilerParams(
            dimension_semantics=("parallel",),          # megacore-shard node tiles (v7x)
            vmem_limit_bytes=32 * 1024 * 1024,          # explicit scoped-VMEM headroom
        ),
        cost_estimate=cost,
    )(node_state, act_w, u)

    # Layout plumbing back to torch's (n_nodes, batch); bool matches torch's `>` result.
    act_weight = aw_bn.T
    act_mask = mask_bn.T.astype(jnp.bool_)

    # The torch forward returns CausalLMOutput(loss=None, logits=None): there is no
    # logits/loss computation to translate.
    return None, None, act_weight, act_mask


def init_params(key, vocab_size, d_model, n_nodes):
    ks = jax.random.split(key, 6)
    return {
        "nodes": jax.random.normal(ks[0], (n_nodes, d_model, d_model), jnp.float32),
        "pred_nodes": jax.random.normal(ks[1], (n_nodes, d_model, d_model), jnp.float32),
        "nodes_act_weight": jax.random.normal(ks[2], (n_nodes, d_model, 1), jnp.float32),
        "pred_scale": jax.random.normal(ks[3], (n_nodes, d_model), jnp.float32),
        "pred_offset": jax.random.normal(ks[4], (n_nodes, d_model), jnp.float32),
        "connections": jax.random.normal(ks[5], (n_nodes, n_nodes), jnp.float32),
    }


if __name__ == "__main__":
    # Small config; n_nodes=256 exercises the tiled grid path (tile_n=128, grid=(2,)).
    vocab_size, d_model, n_nodes, batch, seq = 64, 32, 256, 2, 8

    key = jax.random.PRNGKey(0)
    kp, ks1, ks2, ki, ku = jax.random.split(key, 5)

    params = init_params(kp, vocab_size, d_model, n_nodes)

    node_state = jax.random.normal(ks1, (n_nodes, batch, d_model), jnp.float32)
    node_exhaustion = jnp.zeros((n_nodes, batch), jnp.float32)
    input_pred = jax.random.normal(ks2, (n_nodes, batch, d_model), jnp.float32)
    input_ids = jax.random.randint(ki, (batch, seq), 0, vocab_size, jnp.int32)
    labels = input_ids

    loss, logits, act_weight, act_mask = node_graph_forward(
        params, (node_state, node_exhaustion, input_pred), input_ids, labels, rng_key=ku
    )
    jax.block_until_ready((act_weight, act_mask))

    # act_weight against a pure-JAX reference of the torch math.
    ref = jax.nn.sigmoid(
        jnp.einsum("nbd,ndk->nb", node_state, params["nodes_act_weight"])
    )
    assert loss is None and logits is None
    assert act_weight.shape == (n_nodes, batch)
    assert jnp.allclose(act_weight, ref, atol=1e-5), "act_weight mismatch vs reference"

    # Mask check: the wrapper's uniforms are deterministic given `ku`, so reproduce them.
    u_nb = jax.random.uniform(ku, (batch, n_nodes), dtype=jnp.float32).T   # (N, B)
    ref_mask = ref > u_nb
    decided = jnp.abs(ref - u_nb) > 1e-4          # ignore float-rounding boundary cases
    assert act_mask.dtype == jnp.bool_ and act_mask.shape == (n_nodes, batch)
    assert jnp.array_equal(
        jnp.where(decided, act_mask, False), jnp.where(decided, ref_mask, False)
    ), "act_mask mismatch vs reference"

    print("KERNEL_OK")
</pallas_src>

<mosaic_0001>
module attributes {stable_mosaic.version = 11 : i64} {
  func.func @node_graph_kernel(%arg0: i32, %arg1: memref<128x2x32xf32, #tpu.memory_space<vmem>>, %arg2: memref<128x1x32xf32, #tpu.memory_space<vmem>>, %arg3: memref<2x128xf32, #tpu.memory_space<vmem>>, %arg4: memref<2x128xf32, #tpu.memory_space<vmem>>, %arg5: memref<2x128xi8, #tpu.memory_space<vmem>>) attributes {dimension_semantics = [#tpu.dimension_semantics<parallel>], iteration_bounds = array<i64: 2>, scalar_prefetch = 0 : i64, scratch_operands = 0 : i64, tpu.core_type = #tpu.core_type<tc>, window_params = [{transform_indices = @transform_0, window_bounds = array<i64: 128, 2, 32>}, {transform_indices = @transform_1, window_bounds = array<i64: 128, 1, 32>}, {transform_indices = @transform_2, window_bounds = array<i64: 2, 128>}, {transform_indices = @transform_3, window_bounds = array<i64: 2, 128>}, {transform_indices = @transform_4, window_bounds = array<i64: 2, 128>}]} {
    %c0 = arith.constant 0 : index
    %c0_0 = arith.constant 0 : index
    %c0_1 = arith.constant 0 : index
    %0 = vector.load %arg1[%c0, %c0_0, %c0_1] : memref<128x2x32xf32, #tpu.memory_space<vmem>>, vector<128x2x32xf32>
    %c0_2 = arith.constant 0 : index
    %c0_3 = arith.constant 0 : index
    %c0_4 = arith.constant 0 : index
    %1 = vector.load %arg2[%c0_2, %c0_3, %c0_4] : memref<128x1x32xf32, #tpu.memory_space<vmem>>, vector<128x1x32xf32>
    %2 = vector.broadcast %1 : vector<128x1x32xf32> to vector<128x2x32xf32>
    %3 = arith.mulf %0, %2 : vector<128x2x32xf32>
    %cst = arith.constant dense<0.000000e+00> : vector<128x2xf32>
    %4 = vector.multi_reduction <add>, %3, %cst [2] : vector<128x2x32xf32> to vector<128x2xf32>
    %5 = arith.negf %4 : vector<128x2xf32>
    %6 = math.exp %5 : vector<128x2xf32>
    %cst_5 = arith.constant 1.000000e+00 : f32
    %7 = vector.broadcast %cst_5 : f32 to vector<128x2xf32>
    %8 = arith.addf %7, %6 : vector<128x2xf32>
    %9 = arith.divf %7, %8 : vector<128x2xf32>
    %10 = tpu.transpose %9, [1, 0] : vector<128x2xf32> -> vector<2x128xf32>
    %c0_6 = arith.constant 0 : index
    %c0_7 = arith.constant 0 : index
    %11 = vector.load %arg4[%c0_6, %c0_7] : memref<2x128xf32, #tpu.memory_space<vmem>>, vector<2x128xf32>
    tpu.vector_store %arg4[%c0_6, %c0_7], %10 {strides = array<i32>} : memref<2x128xf32, #tpu.memory_space<vmem>>, vector<2x128xf32>,
    %c0_8 = arith.constant 0 : index
    %c0_9 = arith.constant 0 : index
    %12 = vector.load %arg3[%c0_8, %c0_9] : memref<2x128xf32, #tpu.memory_space<vmem>>, vector<2x128xf32>
    %13 = arith.cmpf ogt, %10, %12 : vector<2x128xf32>
    %14 = arith.extui %13 : vector<2x128xi1> to vector<2x128xi8>
    %c0_10 = arith.constant 0 : index
    %c0_11 = arith.constant 0 : index
    %15 = vector.load %arg5[%c0_10, %c0_11] : memref<2x128xi8, #tpu.memory_space<vmem>>, vector<2x128xi8>
    tpu.vector_store %arg5[%c0_10, %c0_11], %14 {strides = array<i32>} : memref<2x128xi8, #tpu.memory_space<vmem>>, vector<2x128xi8>,
    return
  }
  func.func @transform_0(%arg0: i32) -> (i32, i32, i32) {
    %c0_i32 = arith.constant 0 : i32
    %c0_i32_0 = arith.constant 0 : i32
    %c0_i32_1 = arith.constant 0 : i32
    return %arg0, %c0_i32, %c0_i32_0 : i32, i32, i32
  }
  func.func @transform_1(%arg0: i32) -> (i32, i32, i32) {
    %c0_i32 = arith.constant 0 : i32
    %c0_i32_0 = arith.constant 0 : i32
    %c0_i32_1 = arith.constant 0 : i32
    return %arg0, %c0_i32, %c0_i32_0 : i32, i32, i32
  }
  func.func @transform_2(%arg0: i32) -> (i32, i32) {
    %c0_i32 = arith.constant 0 : i32
    %c0_i32_0 = arith.constant 0 : i32
    return %c0_i32, %arg0 : i32, i32
  }
  func.func @transform_3(%arg0: i32) -> (i32, i32) {
    %c0_i32 = arith.constant 0 : i32
    %c0_i32_0 = arith.constant 0 : i32
    return %c0_i32, %arg0 : i32, i32
  }
  func.func @transform_4(%arg0: i32) -> (i32, i32) {
    %c0_i32 = arith.constant 0 : i32
    %c0_i32_0 = arith.constant 0 : i32
    return %c0_i32, %arg0 : i32, i32
  }
}

</mosaic_0001>

<bundles_post_ra>
// kernel: tpu_custom_call.1
= control target key start
LH: loop header
LB: loop body
LE: loop exit
PB: predicated region body
PF: predicated region fallthrough
CT: control target
= control target key end

     0   :  { %10 = vsyncpa [#allocation3], 0  ;;  %s5463_s0 = inlined_call_operand.vmem [shape: f32[256,2,32], index: 0, kind: input, shape index: {}]   ;;  %s5464_s1 = inlined_call_operand.vmem [shape: f32[256,1,32], index: 1, kind: input, shape index: {}]   ;;  %s5465_s2 = inlined_call_operand.vmem [shape: f32[2,256], index: 2, kind: input, shape index: {}]   ;;  %s5466_s3 = inlined_call_operand.hbm [shape: f32[2,256], index: 3, kind: output, shape index: {0}]   ;;  %s5467_s4 = inlined_call_operand.hbm [shape: s8[2,256], index: 4, kind: output, shape index: {1}]  }
   0x1   :  { %12 = vsyncpa [#allocation3 + $0x1], 0 }
   0x2   :  { %13 = vsyncpa [#allocation5], 0 }
   0x3   :  { %15 = vsyncpa [#allocation5 + $0x1], 0  ;;  %s4462_s15 = smov 0   ;;  %s4464_s16 = smov 0  }
   0x4   :  { %s4466_s17 = smov 0   ;;  %s4468_s18 = smov 0  }
   0x5 LB: > { %s4483_s19 = sadd.s32 4294967295, %s4432_s18   ;;  %s3511_s20 = sadd.s32 4294967294, %s4432_s18   ;;  %s4432_s18 = sphi %s4468_s18, %s5477_s18   ;;  %s4428_s17 = sphi %s4466_s17, %s5476_s17   ;;  %s4424_s16 = sphi %s4464_s16, %s5475_s16   ;;  %s4420_s15 = sphi %s4462_s15, %s5474_s15  }
   0x6   : > { %s4487_s21 = sadd.s32 1, %s4432_s18   ;;  %s106_s22 = sadd.s32 1, %s4428_s17 }
   0x7   : > { %s103_s23 = ssub.s32 %s4432_s18, %s4487_s21  ;;  %p116_p0 = scmp.ne.s32.totalorder %s4428_s17, %s4424_s16 }
   0x8   : > { %p104_p1 = scmp.eq.s32.totalorder %s103_s23, 0  ;;  %p117_p2 = scmp.eq.s32.totalorder %s4483_s19, 1 }
   0x9   : > { %p122_p3 = scmp.ne.s32.totalorder %s4424_s16, %s4420_s15  ;;  %p123_p4 = scmp.eq.s32.totalorder %s3511_s20, 1 }
   0xa   : > { %s4498_s24 = scalar_select %p104_p1, %s4428_s17, %s106_s22  }
   0xb   : > { %p4500_p5 = por %p117_p2, %p116_p0  ;;  %p4504_p6 = por %p123_p4, %p122_p3 }
   0xc   : > { %p3514_p7 = scmp.ge.s32.totalorder %s4432_s18, 1  ;;  %p191_p8 = scmp.lt.s32.totalorder %s4432_s18, 3 }
   0xe   : > { %p192_p9 = pnand %p3514_p7, %p191_p8 }
   0xf   : > { %s3516_s27 = sshll.u32 (!%p192_p9), %s4483_s19, 7  ;;  %vm1398_vm0 = vcmask (!%p192_p9), 254976   ;;  %vm3193_vm1 = vcmask (!%p192_p9), 1041409   ;;  %vm3195_vm2 = vcmask (!%p192_p9), 1042434   ;;  %vm3197_vm3 = vcmask (!%p192_p9), 1043459   ;;  %p240_p11 = scmp.lt.s32.totalorder (!%p192_p9), %s4483_s19, 1 }
  0x10   : > { %195 = sbr.rel (%p192_p9) target bundleno = 562 (0x232), region = 32  ;;  %p230_p10 = scmp.lt.s32.totalorder (!%p192_p9), %s3516_s27, 255  ;;  %vm3199_vm4 = vcmask (!%p192_p9), 1044484   ;;  %vm3201_vm5 = vcmask (!%p192_p9), 1045509   ;;  %vm3203_vm6 = vcmask (!%p192_p9), 1046534   ;;  %vm3205_vm7 = vcmask (!%p192_p9), 1047559  }
  0x11   : > { %s5357_s10 = sand.u32 (!%p192_p9), 1, %s4424_s16   ;;  %vm3366_vm8 = vcmask (!%p192_p9), 1040384   ;;  %vm3367_vm9 = vsmask.f32 (!%p192_p9), 256 }
  0x12   : > { %s3515_s11 = sshll.u32 (!%p192_p9), %s5357_s10, 1  ;;  %vm5371_vm10 = vmand (!%p192_p9), %vm3366_vm8, %vm3367_vm9  ;;  %s5377_s6 = scalar_lea.vmem (!%p192_p9), [#allocation4], %s5357_s10 }
  0x13   : > { %s222_s22 = scalar_lea.vmem (!%p192_p9), [#allocation2], %s3515_s11  ;;  %s3403_s7 = sshll.u32 (!%p192_p9), %s5377_s6, 4  ;;  %s5419_s7 = int_to_ptr.vmem [resolvable:$true] %s3403_s7 }
  0x14   : > { %s3390_s23 = sshll.u32 (!%p192_p9), %s222_s22, 4  ;;  %s4434_s11 = smov (!%p192_p9), [#allocation2]   ;;  %s5364_s23 = int_to_ptr.vmem [resolvable:$true] %s3390_s23 }
  0x17   : > { %s5479_s27 = smov (!%p230_p10, %s3516_s27), 255 }
  0x18   : > { %s3517_s28 = sshll.u32 %s5479_s27, 1  ;;  %s4514_s5 = scalar_lea.vmem %s5464_s1, %s5479_s27 }
  0x19   : > { %s4519_s8 = scalar_lea.vmem %s5463_s0, %s3517_s28  ;;  %v3522_v0 = vld [vmem:[%s4514_s5 + $0x2] ss:$0 sm:$0xff]  ;;  %v3520_v1 = vld [vmem:[%s4514_s5] ss:$0 sm:$0xff]  ;;  %v3523_v2 = vld [vmem:[%s4514_s5 + $0x3] ss:$0 sm:$0xff] }
  0x1a   : > { %v248_v3 = vld [vmem:[%s4519_s8 + $0x4] sm:$0x3]  ;;  %v246_v4 = vld [vmem:[%s4519_s8] sm:$0x3]  ;;  %v249_v5 = vld [vmem:[%s4519_s8 + $0x6] sm:$0x3] }
  0x1b   : > { %v1272_v6 = vmul.f32 %v3522_v0, %v248_v3  ;;  %v1270_v7 = vmul.f32 %v3520_v1, %v246_v4  ;;  %v1273_v8 = vmul.f32 %v3523_v2, %v249_v5  ;;  %v247_v9 = vld [vmem:[%s4519_s8 + $0x2] sm:$0x3]  ;;  %v3521_v10 = vld [vmem:[%s4514_s5 + $0x1] ss:$0 sm:$0xff]  ;;  %v251_v11 = vld [vmem:[%s4519_s8 + $0xa] sm:$0x3] }
  0x1c   : > { %v1271_v12 = vmul.f32 %v3521_v10, %v247_v9  ;;  %v3525_v13 = vld [vmem:[%s4514_s5 + $0x5] ss:$0 sm:$0xff]  ;;  %v250_v14 = vld [vmem:[%s4519_s8 + $0x8] sm:$0x3]  ;;  %v3524_v15 = vld [vmem:[%s4514_s5 + $0x4] ss:$0 sm:$0xff] }
  0x1d   : > { %v1405_v16 = vsel %vm1398_vm0, %v1272_v6, 0.0  ;;  %v1399_v17 = vsel %vm1398_vm0, %v1270_v7, 0.0  ;;  %v1408_v18 = vsel %vm1398_vm0, %v1273_v8, 0.0  ;;  %v1275_v20 = vmul.f32 %v3525_v13, %v251_v11  ;;  %v253_v22 = vld [vmem:[%s4519_s8 + $0xe] sm:$0x3]  ;;  %s241_s9 = scalar_select %p240_p11, %s4483_s19, 1 }
  0x1e   : > { %1406 = vadd.xlane.f32.xlu1 %v1405_v16  ;;  %1400 = vadd.xlane.f32.xlu0 %v1399_v17  ;;  %v1402_v19 = vsel %vm1398_vm0, %v1271_v12, 0.0  ;;  %v1274_v21 = vmul.f32 %v3524_v15, %v250_v14  ;;  %v3527_v23 = vld [vmem:[%s4514_s5 + $0x7] ss:$0 sm:$0xff]  ;;  %v252_v24 = vld [vmem:[%s4519_s8 + $0xc] sm:$0x3]  ;;  %s3777_s27 = sshll.u32 %s4483_s19, 5 }
  0x1f   : > { %v3526_v25 = vld [vmem:[%s4514_s5 + $0x6] ss:$0 sm:$0xff]  ;;  %v1414_v26 = vsel %vm1398_vm0, %v1275_v20, 0.0  ;;  %v1277_v28 = vmul.f32 %v3527_v23, %v253_v22  ;;  %v255_v30 = vld [vmem:[%s4519_s8 + $0x12] sm:$0x3]  ;;  %s3519_s12 = sshll.u32 %s241_s9, 1  ;;  %s5369_s30 = scalar_lea.hbm %s5466_s3, %s3777_s27 }
  0x20   : > { %v1411_v27 = vsel %vm1398_vm0, %v1274_v21, 0.0  ;;  %v1276_v29 = vmul.f32 %v3526_v25, %v252_v24  ;;  %v3529_v31 = vld [vmem:[%s4514_s5 + $0x9] ss:$0 sm:$0xff]  ;;  %v254_v32 = vld [vmem:[%s4519_s8 + $0x10] sm:$0x3]  ;;  %s243_s20 = scalar_lea.vmem %s5465_s2, %s3519_s12  ;;  %s4338_s9 = scalar_lea.vmem %s5364_s23, 32 }
  0x21   : > { %v3528_v33 = vld [vmem:[%s4514_s5 + $0x8] ss:$0 sm:$0xff]  ;;  %v1420_v34 = vsel %vm1398_vm0, %v1277_v28, 0.0  ;;  %v1279_v36 = vmul.f32 %v3529_v31, %v255_v30  ;;  %v257_v38 = vld [vmem:[%s4519_s8 + $0x16] sm:$0x3]  ;;  %p4339_p12 = scmp.ne.s32.totalorder %s5364_s23, %s4338_s9  ;;  %s4342_s12 = sshll.u32 %s4434_s11, 4  ;;  %s4343_s12 = int_to_ptr.vmem [resolvable:$false] %s4342_s12 }
  0x22   : > { %1409 = vadd.xlane.f32.xlu1 %v1408_v18  ;;  %1403 = vadd.xlane.f32.xlu0 %v1402_v19  ;;  %v1417_v35 = vsel %vm1398_vm0, %v1276_v29, 0.0  ;;  %v1278_v37 = vmul.f32 %v3528_v33, %v254_v32  ;;  %v3531_v39 = vld [vmem:[%s4514_s5 + $0xb] ss:$0 sm:$0xff]  ;;  %v256_v40 = vld [vmem:[%s4519_s8 + $0x14] sm:$0x3]  ;;  %s4344_s13 = scalar_lea.vmem %s4343_s12, 64  ;;  %p4345_p1 = scmp.lt.s32.totalorder %s5364_s23, %s4343_s12 }
  0x23   : > { %v3530_v41 = vld [vmem:[%s4514_s5 + $0xa] ss:$0 sm:$0xff]  ;;  %v1426_v42 = vsel %vm1398_vm0, %v1279_v36, 0.0  ;;  %v1281_v44 = vmul.f32 %v3531_v39, %v257_v38  ;;  %v259_v46 = vld [vmem:[%s4519_s8 + $0x1a] sm:$0x3]  ;;  %p4340_p13 = pnand %p4339_p12, %p4500_p5  ;;  %p4346_p2 = scmp.lt.s32.totalorder %s4344_s13, %s4338_s9 }
  0x24   : > { %v1423_v43 = vsel %vm1398_vm0, %v1278_v37, 0.0  ;;  %v1280_v45 = vmul.f32 %v3530_v41, %v256_v40  ;;  %v3533_v47 = vld [vmem:[%s4514_s5 + $0xd] ss:$0 sm:$0xff]  ;;  %v258_v48 = vld [vmem:[%s4519_s8 + $0x18] sm:$0x3] }
  0x25   : > { %v3532_v49 = vld [vmem:[%s4514_s5 + $0xc] ss:$0 sm:$0xff]  ;;  %v1432_v50 = vsel %vm1398_vm0, %v1281_v44, 0.0  ;;  %v1283_v52 = vmul.f32 %v3533_v47, %v259_v46  ;;  %v261_v54 = vld [vmem:[%s4519_s8 + $0x1e] sm:$0x3]  ;;  %p4341_p0 = pneg %p4340_p13  ;;  %p4347_p3 = por %p4346_p2, %p4345_p1 }
  0x26   : > { %1415 = vadd.xlane.f32.xlu1 %v1414_v26  ;;  %1412 = vadd.xlane.f32.xlu0 %v1411_v27  ;;  %v1429_v51 = vsel %vm1398_vm0, %v1280_v45, 0.0  ;;  %v1282_v53 = vmul.f32 %v3532_v49, %v258_v48  ;;  %v3535_v55 = vld [vmem:[%s4514_s5 + $0xf] ss:$0 sm:$0xff]  ;;  %v260_v56 = vld [vmem:[%s4519_s8 + $0x1c] sm:$0x3] }
  0x27   : > { %v3534_v57 = vld [vmem:[%s4514_s5 + $0xe] ss:$0 sm:$0xff]  ;;  %v1438_v58 = vsel %vm1398_vm0, %v1283_v52, 0.0  ;;  %v1285_v60 = vmul.f32 %v3535_v55, %v261_v54  ;;  %v263_v62 = vld [vmem:[%s4519_s8 + $0x22] sm:$0x3]  ;;  %p4348_p4 = pnand %p4347_p3, %p4341_p0 }
  0x28   : > { %v1435_v59 = vsel %vm1398_vm0, %v1282_v53, 0.0  ;;  %v1284_v61 = vmul.f32 %v3534_v57, %v260_v56  ;;  %v3537_v63 = vld [vmem:[%s4514_s5 + $0x11] ss:$0 sm:$0xff]  ;;  %v262_v0 = vld [vmem:[%s4519_s8 + $0x20] sm:$0x3] }
  0x29   : > { %v3536_v1 = vld [vmem:[%s4514_s5 + $0x10] ss:$0 sm:$0xff]  ;;  %v1444_v2 = vsel %vm1398_vm0, %v1285_v60, 0.0  ;;  %v1287_v4 = vmul.f32 %v3537_v63, %v263_v62  ;;  %v265_v6 = vld [vmem:[%s4519_s8 + $0x26] sm:$0x3] }
  0x2a   : > { %1421 = vadd.xlane.f32.xlu1 %v1420_v34  ;;  %1418 = vadd.xlane.f32.xlu0 %v1417_v35  ;;  %v1441_v3 = vsel %vm1398_vm0, %v1284_v61, 0.0  ;;  %v1286_v5 = vmul.f32 %v3536_v1, %v262_v0  ;;  %v3539_v7 = vld [vmem:[%s4514_s5 + $0x13] ss:$0 sm:$0xff]  ;;  %v264_v8 = vld [vmem:[%s4519_s8 + $0x24] sm:$0x3] }
  0x2b   : > { %v3538_v9 = vld [vmem:[%s4514_s5 + $0x12] ss:$0 sm:$0xff]  ;;  %v1450_v10 = vsel %vm1398_vm0, %v1287_v4, 0.0  ;;  %v1289_v12 = vmul.f32 %v3539_v7, %v265_v6  ;;  %v267_v14 = vld [vmem:[%s4519_s8 + $0x2a] sm:$0x3] }
  0x2c   : > { %v1447_v11 = vsel %vm1398_vm0, %v1286_v5, 0.0  ;;  %v1288_v13 = vmul.f32 %v3538_v9, %v264_v8  ;;  %v3541_v15 = vld [vmem:[%s4514_s5 + $0x15] ss:$0 sm:$0xff]  ;;  %v266_v16 = vld [vmem:[%s4519_s8 + $0x28] sm:$0x3] }
  0x2d   : > { %v3540_v17 = vld [vmem:[%s4514_s5 + $0x14] ss:$0 sm:$0xff]  ;;  %v1456_v18 = vsel %vm1398_vm0, %v1289_v12, 0.0  ;;  %v1291_v20 = vmul.f32 %v3541_v15, %v267_v14  ;;  %v269_v22 = vld [vmem:[%s4519_s8 + $0x2e] sm:$0x3] }
  0x2e   : > { %1427 = vadd.xlane.f32.xlu1 %v1426_v42  ;;  %1424 = vadd.xlane.f32.xlu0 %v1423_v43  ;;  %v1453_v19 = vsel %vm1398_vm0, %v1288_v13, 0.0  ;;  %v1290_v21 = vmul.f32 %v3540_v17, %v266_v16  ;;  %v3543_v23 = vld [vmem:[%s4514_s5 + $0x17] ss:$0 sm:$0xff]  ;;  %v268_v24 = vld [vmem:[%s4519_s8 + $0x2c] sm:$0x3] }
  0x2f   : > { %v3542_v25 = vld [vmem:[%s4514_s5 + $0x16] ss:$0 sm:$0xff]  ;;  %v1462_v26 = vsel %vm1398_vm0, %v1291_v20, 0.0  ;;  %v1293_v28 = vmul.f32 %v3543_v23, %v269_v22  ;;  %v271_v30 = vld [vmem:[%s4519_s8 + $0x32] sm:$0x3] }
  0x30   : > { %v1459_v27 = vsel %vm1398_vm0, %v1290_v21, 0.0  ;;  %v1292_v29 = vmul.f32 %v3542_v25, %v268_v24  ;;  %v3545_v31 = vld [vmem:[%s4514_s5 + $0x19] ss:$0 sm:$0xff]  ;;  %v270_v32 = vld [vmem:[%s4519_s8 + $0x30] sm:$0x3] }
  0x31   : > { %v3544_v33 = vld [vmem:[%s4514_s5 + $0x18] ss:$0 sm:$0xff]  ;;  %v1468_v34 = vsel %vm1398_vm0, %v1293_v28, 0.0  ;;  %v1295_v36 = vmul.f32 %v3545_v31, %v271_v30  ;;  %v273_v38 = vld [vmem:[%s4519_s8 + $0x36] sm:$0x3] }
  0x32   : > { %1433 = vadd.xlane.f32.xlu1 %v1432_v50  ;;  %1430 = vadd.xlane.f32.xlu0 %v1429_v51  ;;  %v1465_v35 = vsel %vm1398_vm0, %v1292_v29, 0.0  ;;  %v1294_v37 = vmul.f32 %v3544_v33, %v270_v32  ;;  %v3547_v39 = vld [vmem:[%s4514_s5 + $0x1b] ss:$0 sm:$0xff]  ;;  %v272_v40 = vld [vmem:[%s4519_s8 + $0x34] sm:$0x3] }
  0x33   : > { %v3546_v41 = vld [vmem:[%s4514_s5 + $0x1a] ss:$0 sm:$0xff]  ;;  %v1474_v42 = vsel %vm1398_vm0, %v1295_v36, 0.0  ;;  %v1297_v44 = vmul.f32 %v3547_v39, %v273_v38  ;;  %v3549_v47 = vld [vmem:[%s4514_s5 + $0x1d] ss:$0 sm:$0xff] }
  0x34   : > { %v1471_v43 = vsel %vm1398_vm0, %v1294_v37, 0.0  ;;  %v1296_v45 = vmul.f32 %v3546_v41, %v272_v40  ;;  %v275_v46 = vld [vmem:[%s4519_s8 + $0x3a] sm:$0x3]  ;;  %v274_v48 = vld [vmem:[%s4519_s8 + $0x38] sm:$0x3] }
  0x35   : > { %v3548_v49 = vld [vmem:[%s4514_s5 + $0x1c] ss:$0 sm:$0xff]  ;;  %v1480_v50 = vsel %vm1398_vm0, %v1297_v44, 0.0  ;;  %v1299_v52 = vmul.f32 %v3549_v47, %v275_v46  ;;  %v277_v54 = vld [vmem:[%s4519_s8 + $0x3e] sm:$0x3] }
  0x36   : > { %1439 = vadd.xlane.f32.xlu1 %v1438_v58  ;;  %1436 = vadd.xlane.f32.xlu0 %v1435_v59  ;;  %v1477_v51 = vsel %vm1398_vm0, %v1296_v45, 0.0  ;;  %v1298_v53 = vmul.f32 %v3548_v49, %v274_v48  ;;  %v3551_v55 = vld [vmem:[%s4514_s5 + $0x1f] ss:$0 sm:$0xff]  ;;  %v276_v56 = vld [vmem:[%s4519_s8 + $0x3c] sm:$0x3] }
  0x37   : > { %v3550_v57 = vld [vmem:[%s4514_s5 + $0x1e] ss:$0 sm:$0xff]  ;;  %v1486_v58 = vsel %vm1398_vm0, %v1299_v52, 0.0  ;;  %v1301_v60 = vmul.f32 %v3551_v55, %v277_v54  ;;  %v279_v62 = vld [vmem:[%s4519_s8 + $0x42] sm:$0x3] }
  0x38   : > { %v1483_v59 = vsel %vm1398_vm0, %v1298_v53, 0.0  ;;  %v1300_v61 = vmul.f32 %v3550_v57, %v276_v56  ;;  %v3553_v63 = vld [vmem:[%s4514_s5 + $0x21] ss:$0 sm:$0xff]  ;;  %v3552_v1 = vld [vmem:[%s4514_s5 + $0x20] ss:$0 sm:$0xff] }
  0x39   : > { %v278_v0 = vld [vmem:[%s4519_s8 + $0x40] sm:$0x3]  ;;  %v1303_v4 = vmul.f32 %v3553_v63, %v279_v62  ;;  %v281_v6 = vld [vmem:[%s4519_s8 + $0x46] sm:$0x3]  ;;  %v3555_v7 = vld [vmem:[%s4514_s5 + $0x23] ss:$0 sm:$0xff] }
  0x3a   : > { %1445 = vadd.xlane.f32.xlu1 %v1444_v2  ;;  %1442 = vadd.xlane.f32.xlu0 %v1441_v3  ;;  %v1492_v2 = vsel %vm1398_vm0, %v1301_v60, 0.0  ;;  %v1489_v3 = vsel %vm1398_vm0, %v1300_v61, 0.0  ;;  %v1302_v5 = vmul.f32 %v3552_v1, %v278_v0  ;;  %v280_v8 = vld [vmem:[%s4519_s8 + $0x44] sm:$0x3]  ;;  %v3554_v9 = vld [vmem:[%s4514_s5 + $0x22] ss:$0 sm:$0xff]  ;;  %v1305_v12 = vmul.f32 %v3555_v7, %v281_v6 }
  0x3b   : > { %v1304_v13 = vmul.f32 %v3554_v9, %v280_v8  ;;  %v283_v14 = vld [vmem:[%s4519_s8 + $0x4a] sm:$0x3]  ;;  %v3557_v15 = vld [vmem:[%s4514_s5 + $0x25] ss:$0 sm:$0xff]  ;;  %v282_v16 = vld [vmem:[%s4519_s8 + $0x48] sm:$0x3] }
  0x3c   : > { %v3556_v17 = vld [vmem:[%s4514_s5 + $0x24] ss:$0 sm:$0xff]  ;;  %v1307_v20 = vmul.f32 %v3557_v15, %v283_v14  ;;  %v285_v22 = vld [vmem:[%s4519_s8 + $0x4e] sm:$0x3]  ;;  %v3559_v23 = vld [vmem:[%s4514_s5 + $0x27] ss:$0 sm:$0xff] }
  0x3d   : > { %v1306_v21 = vmul.f32 %v3556_v17, %v282_v16  ;;  %v284_v24 = vld [vmem:[%s4519_s8 + $0x4c] sm:$0x3]  ;;  %v3558_v25 = vld [vmem:[%s4514_s5 + $0x26] ss:$0 sm:$0xff]  ;;  %v1309_v28 = vmul.f32 %v3559_v23, %v285_v22  ;;  %v287_v30 = vld [vmem:[%s4519_s8 + $0x52] sm:$0x3] }
  0x3e   : > { %1451 = vadd.xlane.f32.xlu1 %v1450_v10  ;;  %1448 = vadd.xlane.f32.xlu0 %v1447_v11  ;;  %v1498_v10 = vsel %vm1398_vm0, %v1303_v4, 0.0  ;;  %v1495_v11 = vsel %vm1398_vm0, %v1302_v5, 0.0  ;;  %v1308_v29 = vmul.f32 %v3558_v25, %v284_v24  ;;  %v3561_v31 = vld [vmem:[%s4514_s5 + $0x29] ss:$0 sm:$0xff]  ;;  %v286_v32 = vld [vmem:[%s4519_s8 + $0x50] sm:$0x3] }
  0x3f   : > { %v3560_v33 = vld [vmem:[%s4514_s5 + $0x28] ss:$0 sm:$0xff]  ;;  %v1311_v36 = vmul.f32 %v3561_v31, %v287_v30  ;;  %v289_v38 = vld [vmem:[%s4519_s8 + $0x56] sm:$0x3]  ;;  %v3563_v39 = vld [vmem:[%s4514_s5 + $0x2b] ss:$0 sm:$0xff] }
  0x40   : > { %v1310_v37 = vmul.f32 %v3560_v33, %v286_v32  ;;  %v288_v40 = vld [vmem:[%s4519_s8 + $0x54] sm:$0x3]  ;;  %v3562_v41 = vld [vmem:[%s4514_s5 + $0x2a] ss:$0 sm:$0xff]  ;;  %v1313_v44 = vmul.f32 %v3563_v39, %v289_v38  ;;  %v291_v46 = vld [vmem:[%s4519_s8 + $0x5a] sm:$0x3] }
  0x41   : > { %v1312_v45 = vmul.f32 %v3562_v41, %v288_v40  ;;  %v3565_v47 = vld [vmem:[%s4514_s5 + $0x2d] ss:$0 sm:$0xff]  ;;  %v290_v48 = vld [vmem:[%s4519_s8 + $0x58] sm:$0x3]  ;;  %v3564_v49 = vld [vmem:[%s4514_s5 + $0x2c] ss:$0 sm:$0xff] }
  0x42   : > { %1457 = vadd.xlane.f32.xlu1 %v1456_v18  ;;  %1454 = vadd.xlane.f32.xlu0 %v1453_v19  ;;  %v1504_v18 = vsel %vm1398_vm0, %v1305_v12, 0.0  ;;  %v1501_v19 = vsel %vm1398_vm0, %v1304_v13, 0.0  ;;  %v1315_v52 = vmul.f32 %v3565_v47, %v291_v46  ;;  %v1314_v53 = vmul.f32 %v3564_v49, %v290_v48  ;;  %v293_v54 = vld [vmem:[%s4519_s8 + $0x5e] sm:$0x3]  ;;  %v3567_v55 = vld [vmem:[%s4514_s5 + $0x2f] ss:$0 sm:$0xff] }
  0x43   : > { %v292_v56 = vld [vmem:[%s4519_s8 + $0x5c] sm:$0x3]  ;;  %v3566_v57 = vld [vmem:[%s4514_s5 + $0x2e] ss:$0 sm:$0xff]  ;;  %v1317_v60 = vmul.f32 %v3567_v55, %v293_v54  ;;  %v295_v62 = vld [vmem:[%s4519_s8 + $0x62] sm:$0x3] }
  0x44   : > { %v1316_v61 = vmul.f32 %v3566_v57, %v292_v56  ;;  %v3569_v63 = vld [vmem:[%s4514_s5 + $0x31] ss:$0 sm:$0xff]  ;;  %v294_v0 = vld [vmem:[%s4519_s8 + $0x60] sm:$0x3]  ;;  %v3568_v1 = vld [vmem:[%s4514_s5 + $0x30] ss:$0 sm:$0xff] }
  0x45   : > { %v1319_v4 = vmul.f32 %v3569_v63, %v295_v62  ;;  %v1318_v5 = vmul.f32 %v3568_v1, %v294_v0  ;;  %v297_v6 = vld [vmem:[%s4519_s8 + $0x66] sm:$0x3]  ;;  %v3571_v7 = vld [vmem:[%s4514_s5 + $0x33] ss:$0 sm:$0xff]  ;;  %v296_v8 = vld [vmem:[%s4519_s8 + $0x64] sm:$0x3] }
  0x46   : > { %1463 = vadd.xlane.f32.xlu1 %v1462_v26  ;;  %1460 = vadd.xlane.f32.xlu0 %v1459_v27  ;;  %v1510_v26 = vsel %vm1398_vm0, %v1307_v20, 0.0  ;;  %v1507_v27 = vsel %vm1398_vm0, %v1306_v21, 0.0  ;;  %v3570_v9 = vld [vmem:[%s4514_s5 + $0x32] ss:$0 sm:$0xff]  ;;  %v1321_v12 = vmul.f32 %v3571_v7, %v297_v6  ;;  %v299_v14 = vld [vmem:[%s4519_s8 + $0x6a] sm:$0x3] }
  0x47   : > { %v1320_v13 = vmul.f32 %v3570_v9, %v296_v8  ;;  %v3573_v15 = vld [vmem:[%s4514_s5 + $0x35] ss:$0 sm:$0xff]  ;;  %v298_v16 = vld [vmem:[%s4519_s8 + $0x68] sm:$0x3]  ;;  %v3572_v17 = vld [vmem:[%s4514_s5 + $0x34] ss:$0 sm:$0xff] }
  0x48   : > { %v1323_v20 = vmul.f32 %v3573_v15, %v299_v14  ;;  %v1322_v21 = vmul.f32 %v3572_v17, %v298_v16  ;;  %v301_v22 = vld [vmem:[%s4519_s8 + $0x6e] sm:$0x3]  ;;  %v3575_v23 = vld [vmem:[%s4514_s5 + $0x37] ss:$0 sm:$0xff]  ;;  %v300_v24 = vld [vmem:[%s4519_s8 + $0x6c] sm:$0x3] }
  0x49   : > { %v3574_v25 = vld [vmem:[%s4514_s5 + $0x36] ss:$0 sm:$0xff]  ;;  %v303_v30 = vld [vmem:[%s4519_s8 + $0x72] sm:$0x3]  ;;  %v3577_v31 = vld [vmem:[%s4514_s5 + $0x39] ss:$0 sm:$0xff] }
  0x4a   : > { %1469 = vadd.xlane.f32.xlu1 %v1468_v34  ;;  %1466 = vadd.xlane.f32.xlu0 %v1465_v35  ;;  %v1516_v34 = vsel %vm1398_vm0, %v1309_v28, 0.0  ;;  %v1513_v35 = vsel %vm1398_vm0, %v1308_v29, 0.0  ;;  %v1325_v28 = vmul.f32 %v3575_v23, %v301_v22  ;;  %v1324_v29 = vmul.f32 %v3574_v25, %v300_v24  ;;  %v302_v32 = vld [vmem:[%s4519_s8 + $0x70] sm:$0x3]  ;;  %v3576_v33 = vld [vmem:[%s4514_s5 + $0x38] ss:$0 sm:$0xff] }
  0x4b   : > { %v305_v38 = vld [vmem:[%s4519_s8 + $0x76] sm:$0x3]  ;;  %v3579_v39 = vld [vmem:[%s4514_s5 + $0x3b] ss:$0 sm:$0xff]  ;;  %v304_v40 = vld [vmem:[%s4519_s8 + $0x74] sm:$0x3] }
  0x4c   : > { %v3578_v41 = vld [vmem:[%s4514_s5 + $0x3a] ss:$0 sm:$0xff]  ;;  %v3581_v47 = vld [vmem:[%s4514_s5 + $0x3d] ss:$0 sm:$0xff]  ;;  %v306_v48 = vld [vmem:[%s4519_s8 + $0x78] sm:$0x3] }
  0x4d   : > { %v307_v46 = vld [vmem:[%s4519_s8 + $0x7a] sm:$0x3]  ;;  %v3580_v49 = vld [vmem:[%s4514_s5 + $0x3c] ss:$0 sm:$0xff]  ;;  %v309_v54 = vld [vmem:[%s4519_s8 + $0x7e] sm:$0x3] }
  0x4e   : > { %1475 = vadd.xlane.f32.xlu1 %v1474_v42  ;;  %1472 = vadd.xlane.f32.xlu0 %v1471_v43  ;;  %v1522_v42 = vsel %vm1398_vm0, %v1311_v36, 0.0  ;;  %v1519_v43 = vsel %vm1398_vm0, %v1310_v37, 0.0  ;;  %v1327_v36 = vmul.f32 %v3577_v31, %v303_v30  ;;  %v1326_v37 = vmul.f32 %v3576_v33, %v302_v32  ;;  %v3583_v55 = vld [vmem:[%s4514_s5 + $0x3f] ss:$0 sm:$0xff]  ;;  %v308_v56 = vld [vmem:[%s4519_s8 + $0x7c] sm:$0x3] }
  0x4f   : > { %v3582_v57 = vld [vmem:[%s4514_s5 + $0x3e] ss:$0 sm:$0xff]  ;;  %v311_v62 = vld [vmem:[%s4519_s8 + $0x82] sm:$0x3]  ;;  %v3585_v63 = vld [vmem:[%s4514_s5 + $0x41] ss:$0 sm:$0xff] }
  0x50   : > { %v310_v0 = vld [vmem:[%s4519_s8 + $0x80] sm:$0x3]  ;;  %v313_v6 = vld [vmem:[%s4519_s8 + $0x86] sm:$0x3]  ;;  %v3587_v7 = vld [vmem:[%s4514_s5 + $0x43] ss:$0 sm:$0xff] }
  0x51   : > { %v3584_v1 = vld [vmem:[%s4514_s5 + $0x40] ss:$0 sm:$0xff]  ;;  %v312_v8 = vld [vmem:[%s4519_s8 + $0x84] sm:$0x3]  ;;  %v3586_v9 = vld [vmem:[%s4514_s5 + $0x42] ss:$0 sm:$0xff] }
  0x52   : > { %1481 = vadd.xlane.f32.xlu1 %v1480_v50  ;;  %1478 = vadd.xlane.f32.xlu0 %v1477_v51  ;;  %v1528_v50 = vsel %vm1398_vm0, %v1313_v44, 0.0  ;;  %v1525_v51 = vsel %vm1398_vm0, %v1312_v45, 0.0  ;;  %v1329_v44 = vmul.f32 %v3579_v39, %v305_v38  ;;  %v1328_v45 = vmul.f32 %v3578_v41, %v304_v40  ;;  %v315_v14 = vld [vmem:[%s4519_s8 + $0x8a] sm:$0x3]  ;;  %v3589_v15 = vld [vmem:[%s4514_s5 + $0x45] ss:$0 sm:$0xff] }
  0x53   : > { %v314_v16 = vld [vmem:[%s4519_s8 + $0x88] sm:$0x3]  ;;  %v3588_v17 = vld [vmem:[%s4514_s5 + $0x44] ss:$0 sm:$0xff]  ;;  %v317_v22 = vld [vmem:[%s4519_s8 + $0x8e] sm:$0x3] }
  0x54   : > { %v3591_v23 = vld [vmem:[%s4514_s5 + $0x47] ss:$0 sm:$0xff]  ;;  %v316_v24 = vld [vmem:[%s4519_s8 + $0x8c] sm:$0x3]  ;;  %v3590_v25 = vld [vmem:[%s4514_s5 + $0x46] ss:$0 sm:$0xff] }
  0x55   : > { %v319_v30 = vld [vmem:[%s4519_s8 + $0x92] sm:$0x3]  ;;  %v3593_v31 = vld [vmem:[%s4514_s5 + $0x49] ss:$0 sm:$0xff]  ;;  %v318_v32 = vld [vmem:[%s4519_s8 + $0x90] sm:$0x3] }
  0x56   : > { %1487 = vadd.xlane.f32.xlu1 %v1486_v58  ;;  %1484 = vadd.xlane.f32.xlu0 %v1483_v59  ;;  %v1534_v58 = vsel %vm1398_vm0, %v1315_v52, 0.0  ;;  %v1531_v59 = vsel %vm1398_vm0, %v1314_v53, 0.0  ;;  %v1331_v52 = vmul.f32 %v3581_v47, %v307_v46  ;;  %v1330_v53 = vmul.f32 %v3580_v49, %v306_v48  ;;  %v3592_v33 = vld [vmem:[%s4514_s5 + $0x48] ss:$0 sm:$0xff]  ;;  %v321_v38 = vld [vmem:[%s4519_s8 + $0x96] sm:$0x3] }
  0x57   : > { %v3595_v39 = vld [vmem:[%s4514_s5 + $0x4b] ss:$0 sm:$0xff]  ;;  %v320_v40 = vld [vmem:[%s4519_s8 + $0x94] sm:$0x3]  ;;  %v3594_v41 = vld [vmem:[%s4514_s5 + $0x4a] ss:$0 sm:$0xff] }
  0x58   : > { %v1344_v48 = vmul.f32 %v3594_v41, %v320_v40  ;;  %v3601_v49 = vld [vmem:[%s4514_s5 + $0x51] ss:$0 sm:$0xff]  ;;  %v324_v40 = vld [vmem:[%s4519_s8 + $0x9c] sm:$0x3]  ;;  %v3598_v41 = vld [vmem:[%s4514_s5 + $0x4e] ss:$0 sm:$0xff] }
  0x5a   : > { %1493 = vadd.xlane.f32.xlu1 %v1492_v2  ;;  %1490 = vadd.xlane.f32.xlu0 %v1489_v3  ;;  %v1540_v2 = vsel %vm1398_vm0, %v1317_v60, 0.0  ;;  %v1537_v3 = vsel %vm1398_vm0, %v1316_v61, 0.0  ;;  %v1333_v60 = vmul.f32 %v3583_v55, %v309_v54  ;;  %v1332_v61 = vmul.f32 %v3582_v57, %v308_v56  ;;  %v328_v55 = vld [vmem:[%s4519_s8 + $0xa4] sm:$0x3] }
  0x5e   : > { %1499 = vadd.xlane.f32.xlu1 %v1498_v10  ;;  %1496 = vadd.xlane.f32.xlu0 %v1495_v11  ;;  %v1546_v10 = vsel %vm1398_vm0, %v1319_v4, 0.0  ;;  %v1543_v11 = vsel %vm1398_vm0, %v1318_v5, 0.0  ;;  %v1335_v4 = vmul.f32 %v3585_v63, %v311_v62  ;;  %v1334_v5 = vmul.f32 %v3584_v1, %v310_v0  ;;  %v322_v62 = vld [vmem:[%s4519_s8 + $0x98] sm:$0x3]  ;;  %v3596_v1 = vld [vmem:[%s4514_s5 + $0x4c] ss:$0 sm:$0xff] }
  0x62   : > { %1505 = vadd.xlane.f32.xlu1 %v1504_v18  ;;  %1502 = vadd.xlane.f32.xlu0 %v1501_v19  ;;  %v1552_v18 = vsel %vm1398_vm0, %v1321_v12, 0.0  ;;  %v1549_v19 = vsel %vm1398_vm0, %v1320_v13, 0.0  ;;  %v1337_v12 = vmul.f32 %v3587_v7, %v313_v6  ;;  %v1336_v13 = vmul.f32 %v3586_v9, %v312_v8  ;;  %v3603_v9 = vld [vmem:[%s4514_s5 + $0x53] ss:$0 sm:$0xff] }
  0x63   : > { %v1346_v8 = vmul.f32 %v3596_v1, %v322_v62 }
  0x66   : > { %1511 = vadd.xlane.f32.xlu1 %v1510_v26  ;;  %1508 = vadd.xlane.f32.xlu0 %v1507_v27  ;;  %v1558_v26 = vsel %vm1398_vm0, %v1323_v20, 0.0  ;;  %v1555_v27 = vsel %vm1398_vm0, %v1322_v21, 0.0  ;;  %v1339_v20 = vmul.f32 %v3589_v15, %v315_v14  ;;  %v1338_v21 = vmul.f32 %v3588_v17, %v314_v16  ;;  %v335_v14 = vld [vmem:[%s4519_s8 + $0xb2] sm:$0x3]  ;;  %v3609_v15 = vld [vmem:[%s4514_s5 + $0x59] ss:$0 sm:$0xff] }
  0x67   : > { %v2679_v16 = vlaneseq }
  0x6a   : > { %1517 = vadd.xlane.f32.xlu1 %v1516_v34  ;;  %1514 = vadd.xlane.f32.xlu0 %v1513_v35  ;;  %v1564_v34 = vsel %vm1398_vm0, %v1325_v28, 0.0  ;;  %v1561_v35 = vsel %vm1398_vm0, %v1324_v29, 0.0  ;;  %v1341_v28 = vmul.f32 %v3591_v23, %v317_v22  ;;  %v1340_v29 = vmul.f32 %v3590_v25, %v316_v24  ;;  %v334_v23 = vld [vmem:[%s4519_s8 + $0xb0] sm:$0x3]  ;;  %v3608_v24 = vld [vmem:[%s4514_s5 + $0x58] ss:$0 sm:$0xff] }
  0x6e   : > { %1523 = vadd.xlane.f32.xlu1 %v1522_v42  ;;  %1520 = vadd.xlane.f32.xlu0 %v1519_v43  ;;  %v1570_v42 = vsel %vm1398_vm0, %v1327_v36, 0.0  ;;  %v1567_v43 = vsel %vm1398_vm0, %v1326_v37, 0.0  ;;  %v1343_v36 = vmul.f32 %v3593_v31, %v319_v30  ;;  %v1342_v37 = vmul.f32 %v3592_v33, %v318_v32 }
  0x6f   : > { %v4769_v31 = vand.u32 127, %v2679_v16  ;;  %v1358_v33 = vmul.f32 %v3608_v24, %v334_v23 }
  0x70   : > { %v1618_v46 = vsel %vm1398_vm0, %v1343_v36, 0.0  ;;  %v1615_v47 = vsel %vm1398_vm0, %v1342_v37, 0.0 }
  0x72   : > { %1529 = vadd.xlane.f32.xlu1 %v1528_v50  ;;  %1526 = vadd.xlane.f32.xlu0 %v1525_v51  ;;  %v1576_v50 = vsel %vm1398_vm0, %v1329_v44, 0.0  ;;  %v1573_v51 = vsel %vm1398_vm0, %v1328_v45, 0.0 }
  0x76   : > { %1535 = vadd.xlane.f32.xlu1 %v1534_v58  ;;  %1532 = vadd.xlane.f32.xlu0 %v1531_v59  ;;  %v1582_v58 = vsel %vm1398_vm0, %v1331_v52, 0.0  ;;  %v1579_v59 = vsel %vm1398_vm0, %v1330_v53, 0.0  ;;  %v3600_v53 = vld [vmem:[%s4514_s5 + $0x50] ss:$0 sm:$0xff] }
  0x7a   : > { %1541 = vadd.xlane.f32.xlu1 %v1540_v2  ;;  %1538 = vadd.xlane.f32.xlu0 %v1537_v3  ;;  %v1588_v2 = vsel %vm1398_vm0, %v1333_v60, 0.0  ;;  %v1585_v3 = vsel %vm1398_vm0, %v1332_v61, 0.0  ;;  %v3602_v61 = vld [vmem:[%s4514_s5 + $0x52] ss:$0 sm:$0xff] }
  0x7e   : > { %1547 = vadd.xlane.f32.xlu1 %v1546_v10  ;;  %1544 = vadd.xlane.f32.xlu0 %v1543_v11  ;;  %v1594_v10 = vsel %vm1398_vm0, %v1335_v4, 0.0  ;;  %v1591_v11 = vsel %vm1398_vm0, %v1334_v5, 0.0 }
  0x82   : > { %1553 = vadd.xlane.f32.xlu1 %v1552_v18  ;;  %1550 = vadd.xlane.f32.xlu0 %v1549_v19  ;;  %v1600_v18 = vsel %vm1398_vm0, %v1337_v12, 0.0  ;;  %v1597_v19 = vsel %vm1398_vm0, %v1336_v13, 0.0  ;;  %v3597_v13 = vld [vmem:[%s4514_s5 + $0x4d] ss:$0 sm:$0xff] }
  0x86   : > { %1559 = vadd.xlane.f32.xlu1 %v1558_v26  ;;  %1556 = vadd.xlane.f32.xlu0 %v1555_v27  ;;  %v1606_v26 = vsel %vm1398_vm0, %v1339_v20, 0.0  ;;  %v1603_v27 = vsel %vm1398_vm0, %v1338_v21, 0.0  ;;  %v1627_v20 = vsel %vm1398_vm0, %v1346_v8, 0.0  ;;  %v3617_v8 = vld [vmem:[%s4514_s5 + $0x61] ss:$0 sm:$0xff] }
  0x8a   : > { %1565 = vadd.xlane.f32.xlu1 %v1564_v34  ;;  %1562 = vadd.xlane.f32.xlu0 %v1561_v35  ;;  %v1612_v34 = vsel %vm1398_vm0, %v1341_v28, 0.0  ;;  %v1609_v35 = vsel %vm1398_vm0, %v1340_v29, 0.0 }
  0x8e   : > { %1571 = vadd.xlane.f32.xlu1 %v1570_v42  ;;  %1568 = vadd.xlane.f32.xlu0 %v1567_v43  ;;  %v1345_v42 = vmul.f32 %v3595_v39, %v321_v38  ;;  %v327_v43 = vld [vmem:[%s4519_s8 + $0xa2] sm:$0x3] }
  0x90   : > { %v1624_v54 = vsel %vm1398_vm0, %v1345_v42, 0.0 }
  0x92   : > { %1577 = vadd.xlane.f32.xlu1 %v1576_v50  ;;  %1574 = vadd.xlane.f32.xlu0 %v1573_v51  ;;  %v326_v50 = vld [vmem:[%s4519_s8 + $0xa0] sm:$0x3] }
  0x93   : > { %v1350_v60 = vmul.f32 %v3600_v53, %v326_v50  ;;  %v325_v53 = vld [vmem:[%s4519_s8 + $0x9e] sm:$0x3] }
  0x95   : > { %v1639_v7 = vsel %vm1398_vm0, %v1350_v60, 0.0  ;;  %v3611_v60 = vld [vmem:[%s4514_s5 + $0x5b] ss:$0 sm:$0xff] }
  0x96   : > { %1583 = vadd.xlane.f32.xlu1 %v1582_v58  ;;  %1580 = vadd.xlane.f32.xlu0 %v1579_v59  ;;  %v1621_v58 = vsel %vm1398_vm0, %v1344_v48, 0.0  ;;  %v1351_v59 = vmul.f32 %v3601_v49, %v327_v43  ;;  %v4777_v43 = vshrl.u32 %v2679_v16, 7  ;;  %v3612_v16 = vld [vmem:[%s4514_s5 + $0x5c] ss:$0 sm:$0xff] }
  0x98   : > { %v1642_v6 = vsel %vm1398_vm0, %v1351_v59, 0.0  ;;  %v337_v59 = vld [vmem:[%s4519_s8 + $0xb6] sm:$0x3] }
  0x9a   : > { %1589 = vadd.xlane.f32.xlu1 %v1588_v2  ;;  %1586 = vadd.xlane.f32.xlu0 %v1585_v3  ;;  %v1352_v2 = vmul.f32 %v3602_v61, %v328_v55  ;;  %v329_v3 = vld [vmem:[%s4519_s8 + $0xa6] sm:$0x3]  ;;  %v336_v55 = vld [vmem:[%s4519_s8 + $0xb4] sm:$0x3] }
  0x9b   : > { %v1353_v21 = vmul.f32 %v3603_v9, %v329_v3  ;;  %v342_v9 = vld [vmem:[%s4519_s8 + $0xc0] sm:$0x3] }
  0x9c   : > { %v1645_v17 = vsel %vm1398_vm0, %v1352_v2, 0.0 }
  0x9d   : > { %v1648_v38 = vsel %vm1398_vm0, %v1353_v21, 0.0 }
  0x9e   : > { %1595 = vadd.xlane.f32.xlu1 %v1594_v10  ;;  %1592 = vadd.xlane.f32.xlu0 %v1591_v11  ;;  %v323_v10 = vld [vmem:[%s4519_s8 + $0x9a] sm:$0x3] }
  0x9f   : > { %v1347_v22 = vmul.f32 %v3597_v13, %v323_v10 }
  0xa1   : > { %v1630_v39 = vsel %vm1398_vm0, %v1347_v22, 0.0 }
  0xa2   : > { %1601 = vadd.xlane.f32.xlu1 %v1600_v18  ;;  %1598 = vadd.xlane.f32.xlu0 %v1597_v19 }
  0xa6   : > { %1607 = vadd.xlane.f32.xlu1 %v1606_v26  ;;  %1604 = vadd.xlane.f32.xlu0 %v1603_v27  ;;  %v1359_v27 = vmul.f32 %v3609_v15, %v335_v14  ;;  %v3616_v14 = vld [vmem:[%s4514_s5 + $0x60] ss:$0 sm:$0xff]  ;;  %v338_v15 = vld [vmem:[%s4519_s8 + $0xb8] sm:$0x3] }
  0xaa   : > { %1613 = vadd.xlane.f32.xlu1 %v1612_v34  ;;  %1610 = vadd.xlane.f32.xlu0 %v1609_v35  ;;  %v330_v34 = vld [vmem:[%s4519_s8 + $0xa8] sm:$0x3]  ;;  %v3604_v35 = vld [vmem:[%s4514_s5 + $0x54] ss:$0 sm:$0xff] }
  0xab   : > { %v1407_v44 = vpop.xlane.xlu1 %1406  ;;  %v1401_v45 = vpop.xlane.xlu0 %1400  ;;  %v1354_v49 = vmul.f32 %v3604_v35, %v330_v34  ;;  %v332_v35 = vld [vmem:[%s4519_s8 + $0xac] sm:$0x3] }
  0xac   : > { %v3650_v51 = vmul.f32 -1.442695, %v1407_v44  ;;  %v3648_v52 = vmul.f32 -1.442695, %v1401_v45  ;;  %v1666_v45 = vsel %vm1398_vm0, %v1359_v27, 0.0  ;;  %v1362_v27 = vmul.f32 %v3612_v16, %v338_v15 }
  0xae   : > { %3826 = vpow2.f32 %v3650_v51  ;;  %1619 = vadd.xlane.f32.xlu1 %v1618_v46  ;;  %1616 = vadd.xlane.f32.xlu0 %v1615_v47  ;;  %v1663_v51 = vsel %vm1398_vm0, %v1358_v33, 0.0 }
  0xaf   : > { %3828 = vpow2.f32 %v3648_v52  ;;  %v1410_v56 = vpop.xlane.xlu1 %1409  ;;  %v1404_v57 = vpop.xlane.xlu0 %1403  ;;  %v1348_v52 = vmul.f32 %v3598_v41, %v324_v40 }
  0xb0   : > { %v3651_v63 = vmul.f32 -1.442695, %v1410_v56  ;;  %v3649_v0 = vmul.f32 -1.442695, %v1404_v57 }
  0xb2   : > { %3830 = vpow2.f32 %v3651_v63  ;;  %1625 = vadd.xlane.f32.xlu1 %v1624_v54  ;;  %1622 = vadd.xlane.f32.xlu0 %v1621_v58  ;;  %v3599_v54 = vld [vmem:[%s4514_s5 + $0x4f] ss:$0 sm:$0xff]  ;;  %v3610_v58 = vld [vmem:[%s4514_s5 + $0x5a] ss:$0 sm:$0xff]  ;;  %v331_v63 = vld [vmem:[%s4519_s8 + $0xaa] sm:$0x3] }
  0xb3   : > { %3832 = vpow2.f32 %v3649_v0  ;;  %v1416_v4 = vpop.xlane.xlu1 %1415  ;;  %v1413_v5 = vpop.xlane.xlu0 %1412  ;;  %v3605_v0 = vld [vmem:[%s4514_s5 + $0x55] ss:$0 sm:$0xff]  ;;  %v1360_v13 = vmul.f32 %v3610_v58, %v336_v55  ;;  %v3607_v55 = vld [vmem:[%s4514_s5 + $0x57] ss:$0 sm:$0xff] }
  0xb4   : > { %v3653_v11 = vmul.f32 -1.442695, %v1416_v4  ;;  %v3652_v12 = vmul.f32 -1.442695, %v1413_v5  ;;  %v1651_v4 = vsel %vm1398_vm0, %v1354_v49, 0.0  ;;  %v1355_v23 = vmul.f32 %v3605_v0, %v331_v63 }
  0xb5   : > { %v343_v5 = vld [vmem:[%s4519_s8 + $0xc2] sm:$0x3]  ;;  %v1669_v34 = vsel %vm1398_vm0, %v1360_v13, 0.0 }
  0xb6   : > { %3834 = vpow2.f32 %v3653_v11  ;;  %1643 = vadd.xlane.f32.xlu1 %v1642_v6  ;;  %1640 = vadd.xlane.f32.xlu0 %v1639_v7  ;;  %v1633_v7 = vsel %vm1398_vm0, %v1348_v52, 0.0  ;;  %v1367_v24 = vmul.f32 %v3617_v8, %v343_v5  ;;  %v345_v5 = vld [vmem:[%s4519_s8 + $0xc6] sm:$0x3] }
  0xb7   : > { %3836 = vpow2.f32 %v3652_v12  ;;  %v1422_v18 = vpop.xlane.xlu1 %1421  ;;  %v1419_v19 = vpop.xlane.xlu0 %1418  ;;  %v1349_v12 = vmul.f32 %v3599_v54, %v325_v53  ;;  %v333_v54 = vld [vmem:[%s4519_s8 + $0xae] sm:$0x3] }
  0xb8   : > { %v3827_v25 = vpop.eup %3826  ;;  %v3655_v26 = vmul.f32 -1.442695, %v1422_v18  ;;  %v3654_v30 = vmul.f32 -1.442695, %v1419_v19 }
  0xb9   : > { %v3829_v28 = vpop.eup %3828  ;;  %v2169_v29 = vadd.f32 1.0, %v3827_v25  ;;  %v1636_v33 = vsel %vm1398_vm0, %v1349_v12, 0.0 }
  0xba   : > { %v2167_v32 = vadd.f32 1.0, %v3829_v28  ;;  %3838 = vpow2.f32 %v3655_v26  ;;  %1646 = vadd.xlane.f32.xlu1 %v1645_v17  ;;  %1628 = vadd.xlane.f32.xlu0 %v1627_v20  ;;  %v1361_v20 = vmul.f32 %v3611_v60, %v337_v59  ;;  %v1366_v26 = vmul.f32 %v3616_v14, %v342_v9 }
  0xbb   : > { %3840 = vrcp.f32 %v2169_v29  ;;  %v1428_v36 = vpop.xlane.xlu1 %1427  ;;  %v1425_v37 = vpop.xlane.xlu0 %1424  ;;  %v4801_v29 = vsub.s32 %v4769_v31, %v4777_v43  ;;  %v1654_v43 = vsel %vm1398_vm0, %v1355_v23, 0.0 }
  0xbc   : > { %v3831_v42 = vpop.eup %3830  ;;  %3842 = vrcp.f32 %v2167_v32  ;;  %v3657_v44 = vmul.f32 -1.442695, %v1428_v36  ;;  %v3656_v48 = vmul.f32 -1.442695, %v1425_v37  ;;  %v3606_v36 = vld [vmem:[%s4514_s5 + $0x56] ss:$0 sm:$0xff] }
  0xbd   : > { %v3833_v46 = vpop.eup %3832  ;;  %v2170_v47 = vadd.f32 1.0, %v3831_v42  ;;  %3844 = vpow2.f32 %v3654_v30  ;;  %v1672_v40 = vsel %vm1398_vm0, %v1361_v20, 0.0 }
  0xbe   : > { %v2168_v50 = vadd.f32 1.0, %v3833_v46  ;;  %3846 = vpow2.f32 %v3657_v44  ;;  %1649 = vadd.xlane.f32.xlu1 %v1648_v38  ;;  %1631 = vadd.xlane.f32.xlu0 %v1630_v39  ;;  %v1690_v44 = vsel %vm1398_vm0, %v1367_v24, 0.0  ;;  %v1687_v46 = vsel %vm1398_vm0, %v1366_v26, 0.0  ;;  %v3613_v26 = vld [vmem:[%s4514_s5 + $0x5d] ss:$0 sm:$0xff] }
  0xbf   : > { %3848 = vrcp.f32 %v2170_v47  ;;  %v1434_v56 = vpop.xlane.xlu1 %1433  ;;  %v1431_v57 = vpop.xlane.xlu0 %1430  ;;  %v4812_v47 = vsel %vm1398_vm0, %v1362_v27, 0.0 }
  0xc0   : > { %v3835_v61 = vpop.eup %3834  ;;  %3850 = vrcp.f32 %v2168_v50  ;;  %v3659_v62 = vmul.f32 -1.442695, %v1434_v56  ;;  %v3658_v3 = vmul.f32 -1.442695, %v1431_v57 }
  0xc1   : > { %v3837_v1 = vpop.eup %3836  ;;  %v2172_v2 = vadd.f32 1.0, %v3835_v61  ;;  %3852 = vpow2.f32 %v3656_v48  ;;  %v1356_v48 = vmul.f32 %v3606_v36, %v332_v35  ;;  %v344_v61 = vld [vmem:[%s4519_s8 + $0xc4] sm:$0x3]  ;;  %v3625_v35 = vld [vmem:[%s4514_s5 + $0x69] ss:$0 sm:$0xff] }
  0xc2   : > { %v2171_v6 = vadd.f32 1.0, %v3837_v1  ;;  %3854 = vpow2.f32 %v3659_v62  ;;  %1667 = vadd.xlane.f32.xlu1 %v1666_v45  ;;  %1664 = vadd.xlane.f32.xlu0 %v1663_v51  ;;  %v3618_v1 = vld [vmem:[%s4514_s5 + $0x62] ss:$0 sm:$0xff] }
  0xc3   : > { %3856 = vrcp.f32 %v2172_v2  ;;  %v1440_v10 = vpop.xlane.xlu1 %1439  ;;  %v1437_v11 = vpop.xlane.xlu0 %1436  ;;  %v1657_v12 = vsel %vm1398_vm0, %v1356_v48, 0.0  ;;  %v3624_v48 = vld [vmem:[%s4514_s5 + $0x68] ss:$0 sm:$0xff] }
  0xc4   : > { %v3839_v17 = vpop.eup %3838  ;;  %3858 = vrcp.f32 %v2171_v6  ;;  %v3661_v18 = vmul.f32 -1.442695, %v1440_v10  ;;  %v3660_v19 = vmul.f32 -1.442695, %v1437_v11  ;;  %v3619_v6 = vld [vmem:[%s4514_s5 + $0x63] ss:$0 sm:$0xff] }
  0xc5   : > { %v4797_v21 = vpop.eup %3840  ;;  %v2174_v22 = vadd.f32 1.0, %v3839_v17  ;;  %3860 = vpow2.f32 %v3658_v3 }
  0xc6   : > { %v3843_v25 = vpop.eup %3842  ;;  %3862 = vpow2.f32 %v3661_v18  ;;  %1652 = vadd.xlane.f32.xlu1 %v1651_v4  ;;  %1634 = vadd.xlane.f32.xlu0 %v1633_v7  ;;  %v2692_v58 = vrot.slane %v4797_v21, %v4801_v29  ;;  %v1357_v4 = vmul.f32 %v3607_v55, %v333_v54  ;;  %v1368_v18 = vmul.f32 %v3618_v1, %v344_v61 }
  0xc7   : > { %v3845_v28 = vpop.eup %3844  ;;  %3864 = vrcp.f32 %v2174_v22  ;;  %v1446_v30 = vpop.xlane.xlu1 %1445  ;;  %v2684_v50 = vrot.slane %v3843_v25, %v4801_v29  ;;  %v1369_v21 = vmul.f32 %v3619_v6, %v345_v5  ;;  %v339_v25 = vld [vmem:[%s4519_s8 + $0xba] sm:$0x3] }
  0xc8   : > { %v1443_v32 = vpop.xlane.xlu0 %1442  ;;  %v3847_v37 = vpop.eup %3846  ;;  %v2173_v38 = vadd.f32 1.0, %v3845_v28  ;;  %3866 = vpow2.f32 %v3660_v19  ;;  %v3663_v39 = vmul.f32 -1.442695, %v1446_v30 }
  0xc9   : > { %v3849_v41 = vpop.eup %3848  ;;  %v2176_v42 = vadd.f32 1.0, %v3847_v37  ;;  %v3662_v31 = vmul.f32 -1.442695, %v1443_v32 }
  0xca   : > { %v3851_v45 = vpop.eup %3850  ;;  %3868 = vrcp.f32 %v2173_v38  ;;  %1637 = vadd.xlane.f32.xlu1 %v1636_v33  ;;  %1670 = vadd.xlane.f32.xlu0 %v1669_v34  ;;  %v2696_v56 = vrot.slane %v3849_v41, %v4801_v29  ;;  %v1660_v33 = vsel %vm1398_vm0, %v1357_v4, 0.0  ;;  %v351_v34 = vld [vmem:[%s4519_s8 + $0xd2] sm:$0x3]  ;;  %v1696_v41 = vsel %vm1398_vm0, %v1369_v21, 0.0  ;;  %v352_v21 = vld [vmem:[%s4519_s8 + $0xd4] sm:$0x3] }
  0xcb   : > { %v3853_v49 = vpop.eup %3852  ;;  %v2688_v51 = vrot.slane %v3851_v45, %v4801_v29  ;;  %3870 = vrcp.f32 %v2176_v42  ;;  %v1452_v52 = vpop.xlane.xlu1 %1451  ;;  %v350_v42 = vld [vmem:[%s4519_s8 + $0xd0] sm:$0x3]  ;;  %v1363_v45 = vmul.f32 %v3613_v26, %v339_v25 }
  0xcc   : > { %v1449_v53 = vpop.xlane.xlu0 %1448  ;;  %v3855_v57 = vpop.eup %3854  ;;  %v2175_v59 = vadd.f32 1.0, %v3853_v49  ;;  %3872 = vpow2.f32 %v3663_v39  ;;  %v3665_v60 = vmul.f32 -1.442695, %v1452_v52  ;;  %v1693_v39 = vsel %vm1398_vm0, %v1368_v18, 0.0  ;;  %v346_v49 = vld [vmem:[%s4519_s8 + $0xc8] sm:$0x3] }
  0xcd   : > { %v3857_v62 = vpop.eup %3856  ;;  %v2178_v63 = vadd.f32 1.0, %v3855_v57  ;;  %3874 = vpow2.f32 %v3662_v31  ;;  %v3664_v0 = vmul.f32 -1.442695, %v1449_v53  ;;  %v3194_v2 = vsel %vm3193_vm1, %v2688_v51, %v2684_v50  ;;  %v3620_v50 = vld [vmem:[%s4514_s5 + $0x64] ss:$0 sm:$0xff] }
  0xce   : > { %v3859_v3 = vpop.eup %3858  ;;  %3876 = vrcp.f32 %v2175_v59  ;;  %1673 = vadd.xlane.f32.xlu1 %v1672_v40  ;;  %1655 = vadd.xlane.f32.xlu0 %v1654_v43  ;;  %v2704_v7 = vrot.slane %v3857_v62, %v4801_v29  ;;  %v3196_v8 = vsel %vm3195_vm2, %v2692_v58, %v3194_v2  ;;  %v3614_v57 = vld [vmem:[%s4514_s5 + $0x5e] ss:$0 sm:$0xff]  ;;  %v1370_v4 = vmul.f32 %v3620_v50, %v346_v49 }
  0xcf   : > { %v3861_v9 = vpop.eup %3860  ;;  %3878 = vrcp.f32 %v2178_v63  ;;  %v1458_v10 = vpop.xlane.xlu1 %1457  ;;  %v2700_v13 = vrot.slane %v3859_v3, %v4801_v29  ;;  %v3198_v14 = vsel %vm3197_vm3, %v2696_v56, %v3196_v8  ;;  %v340_v56 = vld [vmem:[%s4519_s8 + $0xbc] sm:$0x3]  ;;  %v1678_v3 = vsel %vm1398_vm0, %v1363_v45, 0.0 }
  0xd0   : > { %v1455_v11 = vpop.xlane.xlu0 %1454  ;;  %v3863_v15 = vpop.eup %3862  ;;  %v2177_v16 = vadd.f32 1.0, %v3861_v9  ;;  %3880 = vpow2.f32 %v3665_v60  ;;  %v3667_v17 = vmul.f32 -1.442695, %v1458_v10  ;;  %v1364_v5 = vmul.f32 %v3614_v57, %v340_v56 }
  0xd1   : > { %v3865_v19 = vpop.eup %3864  ;;  %v2180_v20 = vadd.f32 1.0, %v3863_v15  ;;  %3882 = vpow2.f32 %v3664_v0  ;;  %v3200_v22 = vsel %vm3199_vm4, %v2700_v13, %v3198_v14  ;;  %v3666_v24 = vmul.f32 -1.442695, %v1455_v11  ;;  %v341_v11 = vld [vmem:[%s4519_s8 + $0xbe] sm:$0x3] }
  0xd2   : > { %v3867_v23 = vpop.eup %3866  ;;  %3884 = vrcp.f32 %v2177_v16  ;;  %1691 = vadd.xlane.f32.xlu1 %v1690_v44  ;;  %1688 = vadd.xlane.f32.xlu0 %v1687_v46  ;;  %v3202_v27 = vsel %vm3201_vm5, %v2704_v7, %v3200_v22  ;;  %v2712_v43 = vrot.slane %v3865_v19, %v4801_v29  ;;  %v1375_v46 = vmul.f32 %v3625_v35, %v351_v34  ;;  %v3626_v22 = vld [vmem:[%s4514_s5 + $0x6a] ss:$0 sm:$0xff] }
  0xd3   : > { %3886 = vrcp.f32 %v2180_v20  ;;  %v2179_v28 = vadd.f32 1.0, %v3867_v23  ;;  %v1464_v30 = vpop.xlane.xlu1 %1463  ;;  %v1374_v0 = vmul.f32 %v3624_v48, %v350_v42  ;;  %v1699_v25 = vsel %vm1398_vm0, %v1370_v4, 0.0  ;;  %v3621_v42 = vld [vmem:[%s4514_s5 + $0x65] ss:$0 sm:$0xff] }
  0xd4   : > { %v1461_v32 = vpop.xlane.xlu0 %1460  ;;  %v3869_v36 = vpop.eup %3868  ;;  %3888 = vpow2.f32 %v3667_v17  ;;  %v3669_v37 = vmul.f32 -1.442695, %v1464_v30  ;;  %v1714_v10 = vsel %vm1398_vm0, %v1375_v46, 0.0  ;;  %v1681_v26 = vsel %vm1398_vm0, %v1364_v5, 0.0  ;;  %v3627_v30 = vld [vmem:[%s4514_s5 + $0x6b] ss:$0 sm:$0xff] }
  0xd5   : > { %v3668_v38 = vmul.f32 -1.442695, %v1461_v32  ;;  %v3871_v40 = vpop.eup %3870  ;;  %3890 = vrcp.f32 %v2179_v28  ;;  %v2708_v31 = vrot.slane %v3869_v36, %v4801_v29  ;;  %v1711_v20 = vsel %vm1398_vm0, %v1374_v0, 0.0  ;;  %v353_v28 = vld [vmem:[%s4519_s8 + $0xd6] sm:$0x3] }
  0xd6   : > { %v3873_v44 = vpop.eup %3872  ;;  %3892 = vpow2.f32 %v3666_v24  ;;  %1676 = vadd.xlane.f32.xlu1 %v4812_v47  ;;  %1658 = vadd.xlane.f32.xlu0 %v1657_v12  ;;  %v2720_v52 = vrot.slane %v3871_v40, %v4801_v29  ;;  %v3615_v12 = vld [vmem:[%s4514_s5 + $0x5f] ss:$0 sm:$0xff]  ;;  %v1376_v40 = vmul.f32 %v3626_v22, %v352_v21  ;;  %v1377_v45 = vmul.f32 %v3627_v30, %v353_v28  ;;  %v358_v0 = vld [vmem:[%s4519_s8 + $0xe0] sm:$0x3]  ;;  %v348_v21 = vld [vmem:[%s4519_s8 + $0xcc] sm:$0x3] }
  0xd7   : > { %v3875_v51 = vpop.eup %3874  ;;  %v2182_v53 = vadd.f32 1.0, %v3873_v44  ;;  %3894 = vpow2.f32 %v3669_v37  ;;  %v1470_v54 = vpop.xlane.xlu1 %1469  ;;  %v3204_v58 = vsel %vm3203_vm6, %v2708_v31, %v3202_v27  ;;  %v1365_v27 = vmul.f32 %v3615_v12, %v341_v11  ;;  %v3622_v22 = vld [vmem:[%s4514_s5 + $0x66] ss:$0 sm:$0xff] }
  0xd8   : > { %v1467_v55 = vpop.xlane.xlu0 %1466  ;;  %v3877_v59 = vpop.eup %3876  ;;  %v2181_v60 = vadd.f32 1.0, %v3875_v51  ;;  %3896 = vpow2.f32 %v3668_v38  ;;  %v3671_v47 = vmul.f32 -1.442695, %v1470_v54  ;;  %v4853_v1 = vsel %vm3205_vm7, %v2712_v43, %v3204_v58 }
  0xd9   : > { %v3670_v61 = vmul.f32 -1.442695, %v1467_v55  ;;  %v3879_v62 = vpop.eup %3878  ;;  %v2716_v63 = vrot.slane %v3877_v59, %v4801_v29  ;;  %3898 = vrcp.f32 %v2182_v53 }
  0xda   : > { %v3881_v2 = vpop.eup %3880  ;;  %3900 = vrcp.f32 %v2181_v60  ;;  %1661 = vadd.xlane.f32.xlu1 %v1660_v33  ;;  %1694 = vadd.xlane.f32.xlu0 %v1693_v39  ;;  %v2728_v23 = vrot.slane %v3879_v62, %v4801_v29  ;;  %v1684_v60 = vsel %vm1398_vm0, %v1365_v27, 0.0  ;;  %v1717_v62 = vsel %vm1398_vm0, %v1376_v40, 0.0 }
  0xdb   : > { %v3883_v6 = vpop.eup %3882  ;;  %v2184_v7 = vadd.f32 1.0, %v3881_v2  ;;  %3902 = vpow2.f32 %v3671_v47  ;;  %v1476_v8 = vpop.xlane.xlu1 %1475  ;;  %v3207_v13 = vsel %vm3193_vm1, %v2720_v52, %v2716_v63  ;;  %v359_v47 = vld [vmem:[%s4519_s8 + $0xe2] sm:$0x3]  ;;  %v3633_v63 = vld [vmem:[%s4514_s5 + $0x71] ss:$0 sm:$0xff] }
  0xdc   : > { %v1473_v9 = vpop.xlane.xlu0 %1472  ;;  %v3885_v14 = vpop.eup %3884  ;;  %v2183_v15 = vadd.f32 1.0, %v3883_v6  ;;  %3904 = vpow2.f32 %v3670_v61  ;;  %v3673_v16 = vmul.f32 -1.442695, %v1476_v8  ;;  %v3632_v8 = vld [vmem:[%s4514_s5 + $0x70] ss:$0 sm:$0xff] }
  0xdd   : > { %v3672_v17 = vmul.f32 -1.442695, %v1473_v9  ;;  %v3887_v18 = vpop.eup %3886  ;;  %v2724_v19 = vrot.slane %v3885_v14, %v4801_v29  ;;  %3906 = vrcp.f32 %v2184_v7  ;;  %v1720_v7 = vsel %vm1398_vm0, %v1377_v45, 0.0  ;;  %v354_v14 = vld [vmem:[%s4519_s8 + $0xd8] sm:$0x3] }
  0xde   : > { %v3889_v24 = vpop.eup %3888  ;;  %3908 = vrcp.f32 %v2183_v15  ;;  %1697 = vadd.xlane.f32.xlu1 %v1696_v41  ;;  %1679 = vadd.xlane.f32.xlu0 %v1678_v3  ;;  %v2736_v36 = vrot.slane %v3887_v18, %v4801_v29  ;;  %v347_v41 = vld [vmem:[%s4519_s8 + $0xca] sm:$0x3]  ;;  %v3628_v15 = vld [vmem:[%s4514_s5 + $0x6c] ss:$0 sm:$0xff] }
  0xdf   : > { %v3891_v32 = vpop.eup %3890  ;;  %v2186_v33 = vadd.f32 1.0, %v3889_v24  ;;  %3910 = vpow2.f32 %v3673_v16  ;;  %v1482_v34 = vpop.xlane.xlu1 %1481  ;;  %v3208_v37 = vsel %vm3195_vm2, %v2724_v19, %v3207_v13  ;;  %v1371_v56 = vmul.f32 %v3621_v42, %v347_v41  ;;  %v349_v41 = vld [vmem:[%s4519_s8 + $0xce] sm:$0x3]  ;;  %v3623_v42 = vld [vmem:[%s4514_s5 + $0x67] ss:$0 sm:$0xff] }
  0xe0   : > { %v1479_v35 = vpop.xlane.xlu0 %1478  ;;  %v3893_v38 = vpop.eup %3892  ;;  %3912 = vpow2.f32 %v3672_v17  ;;  %v3675_v39 = vmul.f32 -1.442695, %v1482_v34  ;;  %v2732_v31 = vrot.slane %v3891_v32, %v4801_v29  ;;  %v3209_v46 = vsel %vm3197_vm3, %v2728_v23, %v3208_v37 }
  0xe1   : > { %v3895_v43 = vpop.eup %3894  ;;  %3914 = vrcp.f32 %v2186_v33  ;;  %v2185_v44 = vadd.f32 1.0, %v3893_v38  ;;  %v3674_v50 = vmul.f32 -1.442695, %v1479_v35  ;;  %v1702_v13 = vsel %vm1398_vm0, %v1371_v56, 0.0 }
  0xe2   : > { %v3897_v48 = vpop.eup %3896  ;;  %v2188_v49 = vadd.f32 1.0, %v3895_v43  ;;  %3916 = vpow2.f32 %v3675_v39  ;;  %1715 = vadd.xlane.f32.xlu1 %v1714_v10  ;;  %1712 = vadd.xlane.f32.xlu0 %v1711_v20  ;;  %v3210_v51 = vsel %vm3199_vm4, %v2732_v31, %v3209_v46  ;;  %v1383_v20 = vmul.f32 %v3633_v63, %v359_v47  ;;  %v361_v47 = vld [vmem:[%s4519_s8 + $0xe6] sm:$0x3] }
  0xe3   : > { %v3899_v52 = vpop.eup %3898  ;;  %3918 = vrcp.f32 %v2185_v44  ;;  %v2187_v53 = vadd.f32 1.0, %v3897_v48  ;;  %v1488_v54 = vpop.xlane.xlu1 %1487  ;;  %v3211_v57 = vsel %vm3201_vm5, %v2736_v36, %v3210_v51  ;;  %v1378_v32 = vmul.f32 %v3628_v15, %v354_v14 }
  0xe4   : > { %v1485_v55 = vpop.xlane.xlu0 %1484  ;;  %v3901_v58 = vpop.eup %3900  ;;  %3920 = vrcp.f32 %v2188_v49  ;;  %v3677_v59 = vmul.f32 -1.442695, %v1488_v54  ;;  %v2744_v3 = vrot.slane %v3899_v52, %v4801_v29  ;;  %v1372_v37 = vmul.f32 %v3622_v22, %v348_v21 }
  0xe5   : > { %v3903_v61 = vpop.eup %3902  ;;  %3922 = vrcp.f32 %v2187_v53  ;;  %v2740_v2 = vrot.slane %v3901_v58, %v4801_v29  ;;  %v3676_v6 = vmul.f32 -1.442695, %v1485_v55  ;;  %v1738_v45 = vsel %vm1398_vm0, %v1383_v20, 0.0  ;;  %v3634_v58 = vld [vmem:[%s4514_s5 + $0x72] ss:$0 sm:$0xff] }
  0xe6   : > { %v3905_v4 = vpop.eup %3904  ;;  %v2190_v5 = vadd.f32 1.0, %v3903_v61  ;;  %3924 = vpow2.f32 %v3674_v50  ;;  %1700 = vadd.xlane.f32.xlu1 %v1699_v25  ;;  %1682 = vadd.xlane.f32.xlu0 %v1681_v26  ;;  %v1382_v25 = vmul.f32 %v3632_v8, %v358_v0  ;;  %v1723_v54 = vsel %vm1398_vm0, %v1378_v32, 0.0 }
  0xe7   : > { %v3907_v9 = vpop.eup %3906  ;;  %v2189_v10 = vadd.f32 1.0, %v3905_v4  ;;  %3926 = vpow2.f32 %v3677_v59  ;;  %v1494_v11 = vpop.xlane.xlu1 %1493  ;;  %v3212_v16 = vsel %vm3203_vm6, %v2740_v2, %v3211_v57  ;;  %v1705_v55 = vsel %vm1398_vm0, %v1372_v37, 0.0  ;;  %v360_v57 = vld [vmem:[%s4519_s8 + $0xe4] sm:$0x3]  ;;  %v367_v37 = vld [vmem:[%s4519_s8 + $0xf2] sm:$0x3] }
  0xe8   : > { %v1491_v12 = vpop.xlane.xlu0 %1490  ;;  %v3909_v17 = vpop.eup %3908  ;;  %v2752_v18 = vrot.slane %v3907_v9, %v4801_v29  ;;  %3928 = vrcp.f32 %v2190_v5  ;;  %v3679_v19 = vmul.f32 -1.442695, %v1494_v11  ;;  %v4895_v26 = vsel %vm3205_vm7, %v2744_v3, %v3212_v16  ;;  %v3635_v3 = vld [vmem:[%s4514_s5 + $0x73] ss:$0 sm:$0xff] }
  0xe9   : > { %v3911_v23 = vpop.eup %3910  ;;  %v2748_v24 = vrot.slane %v3909_v17, %v4801_v29  ;;  %3930 = vrcp.f32 %v2189_v10  ;;  %v3678_v30 = vmul.f32 -1.442695, %v1491_v12  ;;  %v1735_v49 = vsel %vm1398_vm0, %v1382_v25, 0.0 }
  0xea   : > { %v3913_v27 = vpop.eup %3912  ;;  %v2192_v28 = vadd.f32 1.0, %v3911_v23  ;;  %3932 = vpow2.f32 %v3676_v6  ;;  %1685 = vadd.xlane.f32.xlu1 %v1684_v60  ;;  %1718 = vadd.xlane.f32.xlu0 %v1717_v62  ;;  %v1373_v56 = vmul.f32 %v3623_v42, %v349_v41  ;;  %v1385_v17 = vmul.f32 %v3635_v3, %v361_v47  ;;  %v3630_v47 = vld [vmem:[%s4514_s5 + $0x6e] ss:$0 sm:$0xff]  ;;  %v3631_v3 = vld [vmem:[%s4514_s5 + $0x6f] ss:$0 sm:$0xff] }
  0xeb   : > { %v3915_v33 = vpop.eup %3914  ;;  %v2191_v34 = vadd.f32 1.0, %v3913_v27  ;;  %3934 = vpow2.f32 %v3679_v19  ;;  %v1500_v35 = vpop.xlane.xlu1 %1499  ;;  %v3214_v38 = vsel %vm3193_vm1, %v2752_v18, %v2748_v24  ;;  %v355_v18 = vld [vmem:[%s4519_s8 + $0xda] sm:$0x3]  ;;  %v3629_v19 = vld [vmem:[%s4514_s5 + $0x6d] ss:$0 sm:$0xff] }
  0xec   : > { %v1497_v36 = vpop.xlane.xlu0 %1496  ;;  %v3917_v39 = vpop.eup %3916  ;;  %3936 = vrcp.f32 %v2192_v28  ;;  %v3681_v40 = vmul.f32 -1.442695, %v1500_v35  ;;  %v2760_v50 = vrot.slane %v3915_v33, %v4801_v29  ;;  %v1708_v12 = vsel %vm1398_vm0, %v1373_v56, 0.0 }
  0xed   : > { %v3919_v31 = vpop.eup %3918  ;;  %3938 = vrcp.f32 %v2191_v34  ;;  %v2194_v43 = vadd.f32 1.0, %v3917_v39  ;;  %v3680_v44 = vmul.f32 -1.442695, %v1497_v36  ;;  %v1379_v36 = vmul.f32 %v3629_v19, %v355_v18  ;;  %v366_v39 = vld [vmem:[%s4519_s8 + $0xf0] sm:$0x3] }
  0xee   : > { %v3921_v46 = vpop.eup %3920  ;;  %v2756_v48 = vrot.slane %v3919_v31, %v4801_v29  ;;  %3940 = vpow2.f32 %v3678_v30  ;;  %1721 = vadd.xlane.f32.xlu1 %v1720_v7  ;;  %1703 = vadd.xlane.f32.xlu0 %v1702_v13  ;;  %v1384_v7 = vmul.f32 %v3634_v58, %v360_v57  ;;  %v3642_v18 = vld [vmem:[%s4514_s5 + $0x7a] ss:$0 sm:$0xff] }
  0xef   : > { %v3923_v51 = vpop.eup %3922  ;;  %3942 = vrcp.f32 %v2194_v43  ;;  %v1506_v52 = vpop.xlane.xlu1 %1505  ;;  %v2768_v62 = vrot.slane %v3921_v46, %v4801_v29 }
  0xf0   : > { %v1503_v53 = vpop.xlane.xlu0 %1502  ;;  %v3925_v59 = vpop.eup %3924  ;;  %3944 = vpow2.f32 %v3681_v40  ;;  %v3683_v60 = vmul.f32 -1.442695, %v1506_v52  ;;  %v2764_v61 = vrot.slane %v3923_v51, %v4801_v29  ;;  %v3215_v4 = vsel %vm3195_vm2, %v2756_v48, %v3214_v38  ;;  %v3641_v38 = vld [vmem:[%s4514_s5 + $0x79] ss:$0 sm:$0xff]  ;;  %v362_v48 = vld [vmem:[%s4519_s8 + $0xe8] sm:$0x3] }
  0xf1   : > { %v3927_v63 = vpop.eup %3926  ;;  %v2193_v0 = vadd.f32 1.0, %v3925_v59  ;;  %3946 = vpow2.f32 %v3680_v44  ;;  %v3682_v2 = vmul.f32 -1.442695, %v1503_v53  ;;  %v3216_v8 = vsel %vm3197_vm3, %v2760_v50, %v3215_v4  ;;  %v3640_v44 = vld [vmem:[%s4514_s5 + $0x78] ss:$0 sm:$0xff] }
  0xf2   : > { %v3929_v5 = vpop.eup %3928  ;;  %v2196_v6 = vadd.f32 1.0, %v3927_v63  ;;  %3948 = vpow2.f32 %v3683_v60  ;;  %1739 = vadd.xlane.f32.xlu1 %v1738_v45  ;;  %1736 = vadd.xlane.f32.xlu0 %v1735_v49  ;;  %v3217_v14 = vsel %vm3199_vm4, %v2764_v61, %v3216_v8  ;;  %v1741_v28 = vsel %vm1398_vm0, %v1384_v7, 0.0  ;;  %v3636_v49 = vld [vmem:[%s4514_s5 + $0x74] ss:$0 sm:$0xff]  ;;  %v356_v53 = vld [vmem:[%s4519_s8 + $0xdc] sm:$0x3] }
  0xf3   : > { %v3931_v9 = vpop.eup %3930  ;;  %3950 = vrcp.f32 %v2193_v0  ;;  %v1512_v10 = vpop.xlane.xlu1 %1511  ;;  %v2776_v13 = vrot.slane %v3929_v5, %v4801_v29  ;;  %v3218_v24 = vsel %vm3201_vm5, %v2768_v62, %v3217_v14  ;;  %v1744_v51 = vsel %vm1398_vm0, %v1385_v17, 0.0  ;;  %v357_v61 = vld [vmem:[%s4519_s8 + $0xde] sm:$0x3]  ;;  %v368_v17 = vld [vmem:[%s4519_s8 + $0xf4] sm:$0x3] }
  0xf4   : > { %v1509_v11 = vpop.xlane.xlu0 %1508  ;;  %v3933_v15 = vpop.eup %3932  ;;  %3952 = vrcp.f32 %v2196_v6  ;;  %v3685_v16 = vmul.f32 -1.442695, %v1512_v10  ;;  %v2772_v20 = vrot.slane %v3931_v9, %v4801_v29  ;;  %v1391_v52 = vmul.f32 %v3641_v38, %v367_v37 }
  0xf5   : > { %v3935_v21 = vpop.eup %3934  ;;  %v2195_v22 = vadd.f32 1.0, %v3933_v15  ;;  %3954 = vpow2.f32 %v3682_v2  ;;  %v3684_v23 = vmul.f32 -1.442695, %v1509_v11  ;;  %v1726_v59 = vsel %vm1398_vm0, %v1379_v36, 0.0 }
  0xf6   : > { %v3937_v25 = vpop.eup %3936  ;;  %v2198_v27 = vadd.f32 1.0, %v3935_v21  ;;  %3956 = vpow2.f32 %v3685_v16  ;;  %1724 = vadd.xlane.f32.xlu1 %v1723_v54  ;;  %1706 = vadd.xlane.f32.xlu0 %v1705_v55  ;;  %v3219_v30 = vsel %vm3203_vm6, %v2772_v20, %v3218_v24  ;;  %v1390_v60 = vmul.f32 %v3640_v44, %v366_v39 }
  0xf7   : > { %v3939_v32 = vpop.eup %3938  ;;  %v2784_v33 = vrot.slane %v3937_v25, %v4801_v29  ;;  %3958 = vrcp.f32 %v2195_v22  ;;  %v1518_v34 = vpop.xlane.xlu1 %1517  ;;  %v4928_v40 = vsel %vm3205_vm7, %v2776_v13, %v3219_v30  ;;  %v1386_v2 = vmul.f32 %v3636_v49, %v362_v48  ;;  %v3637_v48 = vld [vmem:[%s4514_s5 + $0x75] ss:$0 sm:$0xff] }
  0xf8   : > { %v1515_v35 = vpop.xlane.xlu0 %1514  ;;  %v3941_v41 = vpop.eup %3940  ;;  %v2780_v42 = vrot.slane %v3939_v32, %v4801_v29  ;;  %3960 = vrcp.f32 %v2198_v27  ;;  %v3687_v31 = vmul.f32 -1.442695, %v1518_v34  ;;  %v1762_v9 = vsel %vm1398_vm0, %v1391_v52, 0.0 }
  0xf9   : > { %v3686_v43 = vmul.f32 -1.442695, %v1515_v35  ;;  %v4932_v45 = vpop.eup %3942  ;;  %v2197_v46 = vadd.f32 1.0, %v3941_v41  ;;  %3962 = vpow2.f32 %v3684_v23  ;;  %v1759_v14 = vsel %vm1398_vm0, %v1390_v60, 0.0  ;;  %v369_v23 = vld [vmem:[%s4519_s8 + $0xf6] sm:$0x3] }
  0xfa   : > { %v3945_v50 = vpop.eup %3944  ;;  %3964 = vpow2.f32 %v3687_v31  ;;  %1709 = vadd.xlane.f32.xlu1 %v1708_v12  ;;  %1742 = vadd.xlane.f32.xlu0 %v1741_v28  ;;  %v3221_v54 = vsel %vm3193_vm1, %v2784_v33, %v2780_v42  ;;  %v2792_v10 = vrot.slane %v4932_v45, %v4801_v29  ;;  %v1380_v15 = vmul.f32 %v3630_v47, %v356_v53  ;;  %v3643_v28 = vld [vmem:[%s4514_s5 + $0x7b] ss:$0 sm:$0xff]  ;;  %v363_v31 = vld [vmem:[%s4519_s8 + $0xea] sm:$0x3] }
  0xfb   : > { %v3947_v55 = vpop.eup %3946  ;;  %3966 = vrcp.f32 %v2197_v46  ;;  %v2200_v56 = vadd.f32 1.0, %v3945_v50  ;;  %v1524_v57 = vpop.xlane.xlu1 %1523  ;;  %v1381_v16 = vmul.f32 %v3631_v3, %v357_v61  ;;  %v1747_v22 = vsel %vm1398_vm0, %v1386_v2, 0.0 }
  0xfc   : > { %v1521_v58 = vpop.xlane.xlu0 %1520  ;;  %v3949_v62 = vpop.eup %3948  ;;  %v2199_v63 = vadd.f32 1.0, %v3947_v55  ;;  %3968 = vpow2.f32 %v3686_v43  ;;  %v3689_v0 = vmul.f32 -1.442695, %v1524_v57  ;;  %v1729_v39 = vsel %vm1398_vm0, %v1380_v15, 0.0  ;;  %v370_v55 = vld [vmem:[%s4519_s8 + $0xf8] sm:$0x3] }
  0xfd   : > { %v3951_v4 = vpop.eup %3950  ;;  %3970 = vrcp.f32 %v2200_v56  ;;  %v2202_v5 = vadd.f32 1.0, %v3949_v62  ;;  %v3688_v6 = vmul.f32 -1.442695, %v1521_v58  ;;  %v1732_v41 = vsel %vm1398_vm0, %v1381_v16, 0.0  ;;  %v3644_v56 = vld [vmem:[%s4514_s5 + $0x7c] ss:$0 sm:$0xff] }
  0xfe   : > { %v4943_v7 = vpop.eup %3952  ;;  %v2788_v8 = vrot.slane %v3951_v4, %v4801_v29  ;;  %3972 = vrcp.f32 %v2199_v63  ;;  %1745 = vadd.xlane.f32.xlu1 %v1744_v51  ;;  %1727 = vadd.xlane.f32.xlu0 %v1726_v59  ;;  %v1392_v42 = vmul.f32 %v3642_v18, %v368_v17  ;;  %v1393_v46 = vmul.f32 %v3643_v28, %v369_v23 }
  0xff   : > { %v3955_v11 = vpop.eup %3954  ;;  %3974 = vrcp.f32 %v2202_v5  ;;  %v1530_v12 = vpop.xlane.xlu1 %1529  ;;  %v2800_v34 = vrot.slane %v4943_v7, %v4801_v29  ;;  %v1387_v63 = vmul.f32 %v3637_v48, %v363_v31  ;;  %v3638_v5 = vld [vmem:[%s4514_s5 + $0x76] ss:$0 sm:$0xff] }
 0x100   : > { %v1527_v13 = vpop.xlane.xlu0 %1526  ;;  %v3957_v19 = vpop.eup %3956  ;;  %v2201_v20 = vadd.f32 1.0, %v3955_v11  ;;  %3976 = vpow2.f32 %v3689_v0  ;;  %v3691_v21 = vmul.f32 -1.442695, %v1530_v12  ;;  %v3222_v30 = vsel %vm3195_vm2, %v2788_v8, %v3221_v54  ;;  %v364_v0 = vld [vmem:[%s4519_s8 + $0xec] sm:$0x3] }
 0x101   : > { %v3959_v24 = vpop.eup %3958  ;;  %v2204_v25 = vadd.f32 1.0, %v3957_v19  ;;  %3978 = vpow2.f32 %v3688_v6  ;;  %v3690_v27 = vmul.f32 -1.442695, %v1527_v13  ;;  %v3223_v35 = vsel %vm3197_vm3, %v2792_v10, %v3222_v30  ;;  %v371_v6 = vld [vmem:[%s4519_s8 + $0xfa] sm:$0x3] }
 0x102   : > { %v4956_v32 = vpop.eup %3960  ;;  %3980 = vrcp.f32 %v2201_v20  ;;  %1763 = vadd.xlane.f32.xlu1 %v1762_v9  ;;  %1760 = vadd.xlane.f32.xlu0 %v1759_v14  ;;  %v2796_v33 = vrot.slane %v3959_v24, %v4801_v29  ;;  %v1765_v62 = vsel %vm1398_vm0, %v1392_v42, 0.0  ;;  %v1394_v9 = vmul.f32 %v3644_v56, %v370_v55  ;;  %v3645_v10 = vld [vmem:[%s4514_s5 + $0x7d] ss:$0 sm:$0xff]  ;;  %v365_v11 = vld [vmem:[%s4519_s8 + $0xee] sm:$0x3] }
 0x103   : > { %v3963_v36 = vpop.eup %3962  ;;  %3982 = vrcp.f32 %v2204_v25  ;;  %v1536_v37 = vpop.xlane.xlu1 %1535  ;;  %v2808_v51 = vrot.slane %v4956_v32, %v4801_v29  ;;  %v3639_v12 = vld [vmem:[%s4514_s5 + $0x77] ss:$0 sm:$0xff]  ;;  %v1768_v16 = vsel %vm1398_vm0, %v1393_v46, 0.0  ;;  %v1388_v23 = vmul.f32 %v3638_v5, %v364_v0  ;;  %v3647_v46 = vld [vmem:[%s4514_s5 + $0x7f] ss:$0 sm:$0xff] }
 0x104   : > { %v1533_v38 = vpop.xlane.xlu0 %1532  ;;  %v3965_v43 = vpop.eup %3964  ;;  %v2203_v44 = vadd.f32 1.0, %v3963_v36  ;;  %3984 = vpow2.f32 %v3691_v21  ;;  %v3693_v45 = vmul.f32 -1.442695, %v1536_v37  ;;  %v3224_v52 = vsel %vm3199_vm4, %v2796_v33, %v3223_v35 }
 0x105   : > { %v3967_v49 = vpop.eup %3966  ;;  %v2206_v50 = vadd.f32 1.0, %v3965_v43  ;;  %3986 = vpow2.f32 %v3690_v27  ;;  %v3692_v54 = vmul.f32 -1.442695, %v1533_v38  ;;  %v3225_v58 = vsel %vm3201_vm5, %v2800_v34, %v3224_v52  ;;  %v372_v38 = vld [vmem:[%s4519_s8 + $0xfc] sm:$0x3] }
 0x106   : > { %v3969_v53 = vpop.eup %3968  ;;  %3988 = vrcp.f32 %v2203_v44  ;;  %1748 = vadd.xlane.f32.xlu1 %v1747_v22  ;;  %1730 = vadd.xlane.f32.xlu0 %v1729_v39  ;;  %v2804_v57 = vrot.slane %v3967_v49, %v4801_v29  ;;  %v1750_v22 = vsel %vm1398_vm0, %v1387_v63, 0.0  ;;  %v1395_v28 = vmul.f32 %v3645_v10, %v371_v6  ;;  %v3646_v39 = vld [vmem:[%s4514_s5 + $0x7e] ss:$0 sm:$0xff]  ;;  %s3778_s5 = sshll.u32 %s4483_s19, 4 }
 0x107   : > { %v3971_v59 = vpop.eup %3970  ;;  %3990 = vrcp.f32 %v2206_v50  ;;  %v2205_v60 = vadd.f32 1.0, %v3969_v53  ;;  %v1542_v47 = vpop.xlane.xlu1 %1541  ;;  %v1389_v30 = vmul.f32 %v3639_v12, %v365_v11  ;;  %v1771_v34 = vsel %vm1398_vm0, %v1394_v9, 0.0 }
 0x108   : > { %v1539_v61 = vpop.xlane.xlu0 %1538  ;;  %v3973_v2 = vpop.eup %3972  ;;  %v2816_v3 = vrot.slane %v3971_v59, %v4801_v29  ;;  %3992 = vpow2.f32 %v3693_v45  ;;  %v3695_v4 = vmul.f32 -1.442695, %v1542_v47  ;;  %v3226_v13 = vsel %vm3203_vm6, %v2804_v57, %v3225_v58  ;;  %v373_v45 = vld [vmem:[%s4519_s8 + $0xfe] sm:$0x3]  ;;  %s3373_s8 = scalar_lea.sflag [#allocation3], %s5357_s10 }
 0x109   : > { %v3975_v7 = vpop.eup %3974  ;;  %v2812_v8 = vrot.slane %v3973_v2, %v4801_v29  ;;  %3994 = vrcp.f32 %v2205_v60  ;;  %v3694_v15 = vmul.f32 -1.442695, %v1539_v61  ;;  %v4985_v17 = vsel %vm3205_vm7, %v2808_v51, %v3226_v13 }
 0x10a   : > { %v3977_v14 = vpop.eup %3976  ;;  %3996 = vpow2.f32 %v3692_v54  ;;  %1733 = vadd.xlane.f32.xlu1 %v1732_v41  ;;  %1766 = vadd.xlane.f32.xlu0 %v1765_v62  ;;  %v2824_v35 = vrot.slane %v3975_v7, %v4801_v29  ;;  %v1753_v44 = vsel %vm1398_vm0, %v1388_v23, 0.0  ;;  %v1774_v51 = vsel %vm1398_vm0, %v1395_v28, 0.0 }
 0x10b   : > { %v3979_v18 = vpop.eup %3978  ;;  %v2208_v19 = vadd.f32 1.0, %v3977_v14  ;;  %v1548_v20 = vpop.xlane.xlu1 %1547  ;;  %v3228_v24 = vsel %vm3193_vm1, %v2816_v3, %v2812_v8  ;;  %3998 = vpow2.f32 %v3695_v4  ;;  %v1756_v52 = vsel %vm1398_vm0, %v1389_v30, 0.0 }
 0x10c   : > { %v1545_v21 = vpop.xlane.xlu0 %1544  ;;  %v3981_v25 = vpop.eup %3980  ;;  %v3697_v27 = vmul.f32 -1.442695, %v1548_v20  ;;  %4000 = vpow2.f32 %v3694_v15  ;;  %v2207_v42 = vadd.f32 1.0, %v3979_v18  ;;  %v1396_v60 = vmul.f32 %v3646_v39, %v372_v38 }
 0x10d   : > { %v3983_v32 = vpop.eup %3982  ;;  %v2820_v33 = vrot.slane %v3981_v25, %v4801_v29  ;;  %v3696_v37 = vmul.f32 -1.442695, %v1545_v21  ;;  %4002 = vrcp.f32 %v2208_v19  ;;  %v1397_v47 = vmul.f32 %v3647_v46, %v373_v45 }
 0x10e   : > { %v3985_v36 = vpop.eup %3984  ;;  %1769 = vadd.xlane.f32.xlu1 %v1768_v16  ;;  %1751 = vadd.xlane.f32.xlu0 %v1750_v22  ;;  %4004 = vpow2.f32 %v3697_v27  ;;  %v2832_v56 = vrot.slane %v3983_v32, %v4801_v29  ;;  %v1777_v11 = vsel %vm1398_vm0, %v1396_v60, 0.0 }
 0x10f   : > { %v3987_v41 = vpop.eup %3986  ;;  %v1554_v31 = vpop.xlane.xlu1 %1553  ;;  %v3229_v48 = vsel %vm3195_vm2, %v2820_v33, %v3228_v24  ;;  %v2210_v50 = vadd.f32 1.0, %v3985_v36  ;;  %4006 = vpow2.f32 %v3696_v37  ;;  %v1780_v16 = vsel %vm1398_vm0, %v1397_v47, 0.0 }
 0x110   : > { %v1551_v43 = vpop.xlane.xlu0 %1550  ;;  %v3989_v49 = vpop.eup %3988  ;;  %v3699_v54 = vmul.f32 -1.442695, %v1554_v31  ;;  %v3230_v57 = vsel %vm3197_vm3, %v2824_v35, %v3229_v48  ;;  %4008 = vrcp.f32 %v2207_v42  ;;  %v2209_v62 = vadd.f32 1.0, %v3987_v41 }
 0x111   : > { %v3991_v53 = vpop.eup %3990  ;;  %v2828_v55 = vrot.slane %v3989_v49, %v4801_v29  ;;  %v3698_v59 = vmul.f32 -1.442695, %v1551_v43  ;;  %4010 = vrcp.f32 %v2210_v50 }
 0x112   : > { %v3993_v58 = vpop.eup %3992  ;;  %1772 = vadd.xlane.f32.xlu1 %v1771_v34  ;;  %1754 = vadd.xlane.f32.xlu0 %v1753_v44  ;;  %v2840_v2 = vrot.slane %v3991_v53, %v4801_v29  ;;  %4012 = vpow2.f32 %v3699_v54 }
 0x113   : > { %v3995_v61 = vpop.eup %3994  ;;  %v1560_v63 = vpop.xlane.xlu1 %1559  ;;  %v3231_v3 = vsel %vm3199_vm4, %v2828_v55, %v3230_v57  ;;  %v2212_v7 = vadd.f32 1.0, %v3993_v58  ;;  %4014 = vpow2.f32 %v3698_v59 }
 0x114   : > { %v1557_v0 = vpop.xlane.xlu0 %1556  ;;  %v3997_v4 = vpop.eup %3996  ;;  %v3701_v5 = vmul.f32 -1.442695, %v1560_v63  ;;  %v2836_v6 = vrot.slane %v3995_v61, %v4801_v29  ;;  %v3232_v8 = vsel %vm3201_vm5, %v2832_v56, %v3231_v3  ;;  %4016 = vrcp.f32 %v2209_v62 }
 0x115   : > { %v3999_v9 = vpop.eup %3998  ;;  %v3700_v10 = vmul.f32 -1.442695, %v1557_v0  ;;  %v2211_v13 = vadd.f32 1.0, %v3997_v4 }
 0x116   : > { %1775 = vadd.xlane.f32.xlu1 %v1774_v51  ;;  %1757 = vadd.xlane.f32.xlu0 %v1756_v52  ;;  %v3233_v12 = vsel %vm3203_vm6, %v2836_v6, %v3232_v8  ;;  %v4001_v19 = vpop.eup %4000  ;;  %4018 = vpow2.f32 %v3701_v5  ;;  %v2214_v22 = vadd.f32 1.0, %v3999_v9 }
 0x117   : > { %v1566_v14 = vpop.xlane.xlu1 %1565  ;;  %v5011_v18 = vsel %vm3205_vm7, %v2840_v2, %v3233_v12  ;;  %v5013_v21 = vpop.eup %4002  ;;  %4020 = vrcp.f32 %v2212_v7  ;;  %v2213_v30 = vadd.f32 1.0, %v4001_v19 }
 0x118   : > { %v1563_v15 = vpop.xlane.xlu0 %1562  ;;  %v3703_v20 = vmul.f32 -1.442695, %v1566_v14  ;;  %v4005_v23 = vpop.eup %4004  ;;  %4022 = vpow2.f32 %v3700_v10 }
 0x119   : > { %v3702_v24 = vmul.f32 -1.442695, %v1563_v15  ;;  %4024 = vrcp.f32 %v2211_v13  ;;  %v4007_v28 = vpop.eup %4006  ;;  %v2216_v34 = vadd.f32 1.0, %v4005_v23 }
 0x11a   : > { %1778 = vadd.xlane.f32.xlu0 %v1777_v11  ;;  %1781 = vadd.xlane.f32.xlu1 %v1780_v16  ;;  %4026 = vpow2.f32 %v3703_v20  ;;  %v5015_v33 = vpop.eup %4008  ;;  %v2215_v38 = vadd.f32 1.0, %v4007_v28 }
 0x11b   : > { %v1572_v25 = vpop.xlane.xlu1 %1571  ;;  %4028 = vrcp.f32 %v2214_v22  ;;  %v5017_v35 = vpop.eup %4010 }
 0x11c   : > { %v1569_v27 = vpop.xlane.xlu0 %1568  ;;  %v3705_v32 = vmul.f32 -1.442695, %v1572_v25  ;;  %4030 = vpow2.f32 %v3702_v24  ;;  %v4013_v37 = vpop.eup %4012 }
 0x11d   : > { %v3704_v36 = vmul.f32 -1.442695, %v1569_v27  ;;  %v4015_v42 = vpop.eup %4014  ;;  %v2218_v46 = vadd.f32 1.0, %v4013_v37 }
 0x11e   : > { %4032 = vpow2.f32 %v3705_v32  ;;  %v5019_v43 = vpop.eup %4016  ;;  %v2217_v49 = vadd.f32 1.0, %v4015_v42 }
 0x11f   : > { %v1578_v39 = vpop.xlane.xlu1 %1577  ;;  %4034 = vrcp.f32 %v2213_v30 }
 0x120   : > { %v1575_v41 = vpop.xlane.xlu0 %1574  ;;  %v3707_v31 = vmul.f32 -1.442695, %v1578_v39  ;;  %4036 = vrcp.f32 %v2216_v34  ;;  %v4019_v45 = vpop.eup %4018 }
 0x121   : > { %v3706_v44 = vmul.f32 -1.442695, %v1575_v41  ;;  %4038 = vpow2.f32 %v3704_v36  ;;  %v5021_v48 = vpop.eup %4020  ;;  %v2220_v55 = vadd.f32 1.0, %v4019_v45 }
 0x122   : > { %4040 = vrcp.f32 %v2215_v38  ;;  %v4023_v52 = vpop.eup %4022 }
 0x123   : > { %v1584_v50 = vpop.xlane.xlu1 %1583  ;;  %4042 = vpow2.f32 %v3707_v31  ;;  %v5023_v54 = vpop.eup %4024  ;;  %v2219_v59 = vadd.f32 1.0, %v4023_v52 }
 0x124   : > { %v1581_v51 = vpop.xlane.xlu0 %1580  ;;  %v3709_v53 = vmul.f32 -1.442695, %v1584_v50  ;;  %4044 = vpow2.f32 %v3706_v44  ;;  %v4027_v56 = vpop.eup %4026 }
 0x125   : > { %4046 = vrcp.f32 %v2218_v46  ;;  %v3708_v57 = vmul.f32 -1.442695, %v1581_v51  ;;  %v5025_v58 = vpop.eup %4028  ;;  %v2222_v0 = vadd.f32 1.0, %v4027_v56 }
 0x126   : > { %4048 = vrcp.f32 %v2217_v49  ;;  %v4031_v61 = vpop.eup %4030 }
 0x127   : > { %v1590_v60 = vpop.xlane.xlu1 %1589  ;;  %4050 = vpow2.f32 %v3709_v53  ;;  %v2221_v3 = vadd.f32 1.0, %v4031_v61 }
 0x128   : > { %v1587_v47 = vpop.xlane.xlu0 %1586  ;;  %v3711_v62 = vmul.f32 -1.442695, %v1590_v60  ;;  %v4033_v63 = vpop.eup %4032  ;;  %4052 = vrcp.f32 %v2220_v55 }
 0x129   : > { %v5027_v2 = vpop.eup %4034  ;;  %4054 = vpow2.f32 %v3708_v57  ;;  %v2224_v5 = vadd.f32 1.0, %v4033_v63  ;;  %v3710_v9 = vmul.f32 -1.442695, %v1587_v47  ;;  %v2848_v63 = vrot.slane %v5013_v21, %v4801_v29 }
 0x12a   : > { %v5029_v4 = vpop.eup %4036  ;;  %4056 = vrcp.f32 %v2219_v59 }
 0x12b   : > { %v1596_v6 = vpop.xlane.xlu1 %1595  ;;  %v4039_v8 = vpop.eup %4038  ;;  %4058 = vpow2.f32 %v3711_v62 }
 0x12c   : > { %v1593_v7 = vpop.xlane.xlu0 %1592  ;;  %v5031_v10 = vpop.eup %4040  ;;  %4060 = vrcp.f32 %v2222_v0  ;;  %v3713_v11 = vmul.f32 -1.442695, %v1596_v6  ;;  %v2223_v13 = vadd.f32 1.0, %v4039_v8  ;;  %v2844_v0 = vrot.slane %v5015_v33, %v4801_v29 }
 0x12d   : > { %v4043_v12 = vpop.eup %4042  ;;  %4062 = vrcp.f32 %v2221_v3  ;;  %v3712_v15 = vmul.f32 -1.442695, %v1593_v7  ;;  %v2852_v6 = vrot.slane %v5019_v43, %v4801_v29 }
 0x12e   : > { %v4045_v14 = vpop.eup %4044  ;;  %4064 = vrcp.f32 %v2224_v5  ;;  %v2226_v22 = vadd.f32 1.0, %v4043_v12 }
 0x12f   : > { %v1602_v16 = vpop.xlane.xlu1 %1601  ;;  %v5033_v20 = vpop.eup %4046  ;;  %4066 = vpow2.f32 %v3710_v9  ;;  %v2225_v27 = vadd.f32 1.0, %v4045_v14 }
 0x130   : > { %v1599_v19 = vpop.xlane.xlu0 %1598  ;;  %v5035_v23 = vpop.eup %4048  ;;  %4068 = vpow2.f32 %v3713_v11  ;;  %v3715_v24 = vmul.f32 -1.442695, %v1602_v16  ;;  %v3235_v16 = vsel %vm3193_vm1, %v2848_v63, %v2844_v0 }
 0x131   : > { %v4051_v25 = vpop.eup %4050  ;;  %4070 = vrcp.f32 %v2223_v13  ;;  %v3714_v30 = vmul.f32 -1.442695, %v1599_v19 }
 0x132   : > { %v5037_v28 = vpop.eup %4052  ;;  %4072 = vpow2.f32 %v3712_v15  ;;  %v2228_v39 = vadd.f32 1.0, %v4051_v25  ;;  %v2856_v15 = vrot.slane %v5017_v35, %v4801_v29 }
 0x133   : > { %v1608_v32 = vpop.xlane.xlu1 %1607  ;;  %v4055_v36 = vpop.eup %4054  ;;  %4074 = vrcp.f32 %v2226_v22  ;;  %v2860_v22 = vrot.slane %v5023_v54, %v4801_v29 }
 0x134   : > { %v1605_v34 = vpop.xlane.xlu0 %1604  ;;  %v3717_v37 = vmul.f32 -1.442695, %v1608_v32  ;;  %v5039_v38 = vpop.eup %4056  ;;  %4076 = vpow2.f32 %v3715_v24  ;;  %v2227_v44 = vadd.f32 1.0, %v4055_v36  ;;  %v3236_v24 = vsel %vm3195_vm2, %v2852_v6, %v3235_v16 }
 0x135   : > { %v4059_v41 = vpop.eup %4058  ;;  %4078 = vrcp.f32 %v2225_v27  ;;  %v3716_v42 = vmul.f32 -1.442695, %v1605_v34  ;;  %v3237_v54 = vsel %vm3197_vm3, %v2856_v15, %v3236_v24 }
 0x136   : > { %v5041_v31 = vpop.eup %4060  ;;  %4080 = vpow2.f32 %v3714_v30  ;;  %v2230_v52 = vadd.f32 1.0, %v4059_v41 }
 0x137   : > { %v1614_v45 = vpop.xlane.xlu1 %1613  ;;  %v5043_v49 = vpop.eup %4062  ;;  %4082 = vpow2.f32 %v3717_v37 }
 0x138   : > { %v1611_v46 = vpop.xlane.xlu0 %1610  ;;  %v3719_v50 = vmul.f32 -1.442695, %v1614_v45  ;;  %v5045_v51 = vpop.eup %4064  ;;  %4084 = vrcp.f32 %v2228_v39  ;;  %v2864_v39 = vrot.slane %v5021_v48, %v4801_v29  ;;  %v3238_v45 = vsel %vm3199_vm4, %v2860_v22, %v3237_v54 }
 0x139   : > { %v4067_v53 = vpop.eup %4066  ;;  %4086 = vpow2.f32 %v3716_v42  ;;  %v3718_v55 = vmul.f32 -1.442695, %v1611_v46 }
 0x13a   : > { %v4069_v56 = vpop.eup %4068  ;;  %4088 = vrcp.f32 %v2227_v44  ;;  %v2229_v3 = vadd.f32 1.0, %v4067_v53  ;;  %v2868_v44 = vrot.slane %v5027_v2, %v4801_v29  ;;  %v2880_v2 = vrot.slane %v5029_v4, %v4801_v29 }
 0x13b   : > { %v1620_v57 = vpop.xlane.xlu1 %1619  ;;  %v5047_v60 = vpop.eup %4070  ;;  %4090 = vpow2.f32 %v3719_v50  ;;  %v2232_v7 = vadd.f32 1.0, %v4069_v56  ;;  %v2872_v56 = vrot.slane %v5025_v58, %v4801_v29  ;;  %v2884_v58 = vrot.slane %v5035_v23, %v4801_v29 }
 0x13c   : > { %v1617_v59 = vpop.xlane.xlu0 %1616  ;;  %v3721_v47 = vmul.f32 -1.442695, %v1620_v57  ;;  %v4073_v62 = vpop.eup %4072  ;;  %4092 = vrcp.f32 %v2230_v52  ;;  %v2888_v23 = vrot.slane %v5033_v20, %v4801_v29  ;;  %v2912_v20 = vrot.slane %v5045_v51, %v4801_v29 }
 0x13d   : > { %v3720_v61 = vmul.f32 -1.442695, %v1617_v59  ;;  %v5053_v5 = vpop.eup %4074  ;;  %4094 = vpow2.f32 %v3718_v55  ;;  %v2231_v33 = vadd.f32 1.0, %v4073_v62  ;;  %v2876_v62 = vrot.slane %v5031_v10, %v4801_v29 }
 0x13e   : > { %v4077_v8 = vpop.eup %4076  ;;  %4096 = vpow2.f32 %v3721_v47  ;;  %v3239_v47 = vsel %vm3201_vm5, %v2864_v39, %v3238_v45  ;;  %v2908_v24 = vrot.slane %v5047_v60, %v4801_v29  ;;  %v2904_v51 = vrot.slane %v5041_v31, %v4801_v29 }
 0x13f   : > { %v1626_v9 = vpop.xlane.xlu1 %1625  ;;  %v5057_v12 = vpop.eup %4078  ;;  %4098 = vpow2.f32 %v3720_v61  ;;  %v2234_v19 = vadd.f32 1.0, %v4077_v8  ;;  %v3240_v63 = vsel %vm3203_vm6, %v2868_v44, %v3239_v47  ;;  %v2920_v31 = vrot.slane %v5053_v5, %v4801_v29 }
 0x140   : > { %v1623_v11 = vpop.xlane.xlu0 %1622  ;;  %v3723_v21 = vmul.f32 -1.442695, %v1626_v9  ;;  %v4081_v14 = vpop.eup %4080  ;;  %4100 = vrcp.f32 %v2229_v3  ;;  %v3249_v45 = vsel %vm3193_vm1, %v2912_v20, %v2908_v24 }
 0x141   : > { %v3722_v13 = vmul.f32 -1.442695, %v1623_v11  ;;  %v4083_v43 = vpop.eup %4082  ;;  %4102 = vrcp.f32 %v2232_v7  ;;  %v2233_v34 = vadd.f32 1.0, %v4081_v14  ;;  %v5094_v11 = vsel %vm3205_vm7, %v2872_v56, %v3240_v63 }
 0x142   : > { %v5065_v25 = vpop.eup %4084  ;;  %4104 = vpow2.f32 %v3723_v21  ;;  %v2236_v37 = vadd.f32 1.0, %v4083_v43  ;;  %v3242_v14 = vsel %vm3193_vm1, %v2880_v2, %v2876_v62  ;;  %v2892_v43 = vrot.slane %v5039_v38, %v4801_v29 }
 0x143   : > { %v1644_v27 = vpop.xlane.xlu1 %1643  ;;  %v4087_v32 = vpop.eup %4086  ;;  %4106 = vpow2.f32 %v3722_v13  ;;  %v2896_v38 = vrot.slane %v5037_v28, %v4801_v29 }
 0x144   : > { %v1641_v30 = vpop.xlane.xlu0 %1640  ;;  %v3729_v36 = vmul.f32 -1.442695, %v1644_v27  ;;  %v5067_v35 = vpop.eup %4088  ;;  %4108 = vrcp.f32 %v2231_v33  ;;  %v2235_v50 = vadd.f32 1.0, %v4087_v32 }
 0x145   : > { %v4091_v41 = vpop.eup %4090  ;;  %4110 = vrcp.f32 %v2234_v19  ;;  %v3728_v42 = vmul.f32 -1.442695, %v1641_v30  ;;  %v3243_v19 = vsel %vm3195_vm2, %v2884_v58, %v3242_v14 }
 0x146   : > { %v5075_v46 = vpop.eup %4092  ;;  %4112 = vpow2.f32 %v3729_v36  ;;  %v2238_v59 = vadd.f32 1.0, %v4091_v41  ;;  %v2900_v41 = vrot.slane %v5043_v49, %v4801_v29 }
 0x147   : > { %v1647_v52 = vpop.xlane.xlu1 %1646  ;;  %3328 = vxpose.xlu0.b32.start [1/16] (narrow) %v4853_v1, 8  ;;  %v4095_v55 = vpop.eup %4094  ;;  %4114 = vrcp.f32 %v2233_v34 }
 0x148   : > { %v1629_v53 = vpop.xlane.xlu0 %1628  ;;  %v3730_v48 = vmul.f32 -1.442695, %v1647_v52  ;;  %v4097_v57 = vpop.eup %4096  ;;  %4116 = vrcp.f32 %v2236_v37  ;;  %v2237_v1 = vadd.f32 1.0, %v4095_v55  ;;  %v3244_v37 = vsel %vm3197_vm3, %v2888_v23, %v3243_v19 }
 0x149   : > { %v4099_v61 = vpop.eup %4098  ;;  %4118 = vpow2.f32 %v3728_v42  ;;  %v3724_v3 = vmul.f32 -1.442695, %v1629_v53  ;;  %v2240_v8 = vadd.f32 1.0, %v4097_v57  ;;  %v3245_v28 = vsel %vm3199_vm4, %v2892_v43, %v3244_v37 }
 0x14a   : > { %v5086_v0 = vpop.eup %4100  ;;  %4120 = vrcp.f32 %v2235_v50  ;;  %v2239_v9 = vadd.f32 1.0, %v4099_v61  ;;  %v3246_v5 = vsel %vm3201_vm5, %v2896_v38, %v3245_v28 }
 0x14b   : > { %v1650_v4 = vpop.xlane.xlu1 %1649  ;;  %3329 = vxpose.xlu0.b32.cont [2/16] (narrow) %v4895_v26, 8  ;;  %v5091_v7 = vpop.eup %4102  ;;  %4122 = vpow2.f32 %v3730_v48  ;;  %v3247_v47 = vsel %vm3203_vm6, %v2900_v41, %v3246_v5 }
 0x14c   : > { %v1632_v6 = vpop.xlane.xlu0 %1631  ;;  %v4105_v10 = vpop.eup %4104  ;;  %4124 = vrcp.f32 %v2238_v59  ;;  %v3731_v33 = vmul.f32 -1.442695, %v1650_v4  ;;  %v2944_v55 = vrot.slane %v5091_v7, %v4801_v29  ;;  %v2928_v4 = vrot.slane %v5065_v25, %v4801_v29 }
 0x14d   : > { %v4107_v21 = vpop.eup %4106  ;;  %4126 = vrcp.f32 %v2237_v1  ;;  %v3725_v13 = vmul.f32 -1.442695, %v1632_v6  ;;  %v2242_v27 = vadd.f32 1.0, %v4105_v10  ;;  %v2932_v25 = vrot.slane %v5086_v0, %v4801_v29 }
 0x14e   : > { %v5099_v26 = vpop.eup %4108  ;;  %4128 = vpow2.f32 %v3724_v3  ;;  %v2241_v32 = vadd.f32 1.0, %v4107_v21 }
 0x14f   : > { %v1668_v15 = vpop.xlane.xlu1 %1667  ;;  %3330 = vxpose.xlu0.b32.cont [3/16] (narrow) %v4928_v40, 8  ;;  %v5105_v22 = vpop.eup %4110  ;;  %4130 = vrcp.f32 %v2240_v8  ;;  %v2916_v40 = vrot.slane %v5057_v12, %v4801_v29  ;;  %v2940_v48 = vrot.slane %v5099_v26, %v4801_v29 }
 0x150   : > { %v1665_v16 = vpop.xlane.xlu0 %1664  ;;  %v4113_v30 = vpop.eup %4112  ;;  %4132 = vrcp.f32 %v2239_v9  ;;  %v3737_v36 = vmul.f32 -1.442695, %v1668_v15  ;;  %v2952_v8 = vrot.slane %v5105_v22, %v4801_v29 }
 0x151   : > { %v4115_v34 = vpop.eup %4114  ;;  %4134 = vpow2.f32 %v3725_v13  ;;  %v2248_v39 = vadd.f32 1.0, %v4113_v30  ;;  %v3736_v44 = vmul.f32 -1.442695, %v1665_v16  ;;  %v3250_v53 = vsel %vm3195_vm2, %v2916_v40, %v3249_v45 }
 0x152   : > { %v5118_v60 = vpop.eup %4116  ;;  %4136 = vpow2.f32 %v3731_v33  ;;  %v2948_v57 = vrot.slane %v4115_v34, %v4801_v29  ;;  %v3251_v63 = vsel %vm3197_vm3, %v2920_v31, %v3250_v53  ;;  %v3256_v10 = vsel %vm3193_vm1, %v2944_v55, %v2940_v48 }
 0x153   : > { %v1653_v54 = vpop.xlane.xlu1 %1652  ;;  %3331 = vxpose.xlu0.b32.cont [4/16] (narrow) %v4985_v17, 8  ;;  %v4119_v42 = vpop.eup %4118  ;;  %4138 = vrcp.f32 %v2242_v27  ;;  %v2924_v17 = vrot.slane %v5067_v35, %v4801_v29  ;;  %v3248_v16 = vsel %vm3205_vm7, %v2904_v51, %v3247_v47  ;;  %v2960_v24 = vrot.slane %v5118_v60, %v4801_v29 }
 0x154   : > { %v1635_v12 = vpop.xlane.xlu0 %1634  ;;  %v5127_v50 = vpop.eup %4120  ;;  %4140 = vrcp.f32 %v2241_v32  ;;  %v2247_v2 = vadd.f32 1.0, %v4119_v42  ;;  %v3732_v62 = vmul.f32 -1.442695, %v1653_v54  ;;  %v3257_v14 = vsel %vm3195_vm2, %v2948_v57, %v3256_v10 }
 0x155   : > { %v3726_v52 = vmul.f32 -1.442695, %v1635_v12  ;;  %v4123_v49 = vpop.eup %4122  ;;  %4142 = vpow2.f32 %v3737_v36  ;;  %v3252_v6 = vsel %vm3199_vm4, %v2924_v17, %v3251_v63  ;;  %v2956_v23 = vrot.slane %v5127_v50, %v4801_v29 }
 0x156   : > { %v5137_v56 = vpop.eup %4124  ;;  %4144 = vrcp.f32 %v2248_v39  ;;  %v2249_v3 = vadd.f32 1.0, %v4123_v49  ;;  %v3253_v22 = vsel %vm3201_vm5, %v2928_v4, %v3252_v6  ;;  %v3258_v27 = vsel %vm3197_vm3, %v2952_v8, %v3257_v14 }
 0x157   : > { %v1638_v59 = vpop.xlane.xlu1 %1637  ;;  %3332 = vxpose.xlu0.b32.cont [5/16] (narrow) %v5011_v18, 8  ;;  %v5142_v61 = vpop.eup %4126  ;;  %4146 = vpow2.f32 %v3736_v44  ;;  %v3254_v38 = vsel %vm3203_vm6, %v2932_v25, %v3253_v22  ;;  %v3259_v34 = vsel %vm3199_vm4, %v2956_v23, %v3258_v27  ;;  %v2968_v41 = vrot.slane %v5137_v56, %v4801_v29 }
 0x158   : > { %v1671_v35 = vpop.xlane.xlu0 %1670  ;;  %v3727_v1 = vmul.f32 -1.442695, %v1638_v59  ;;  %v4129_v58 = vpop.eup %4128  ;;  %4148 = vpow2.f32 %v3726_v52  ;;  %v3260_v28 = vsel %vm3201_vm5, %v2960_v24, %v3259_v34 }
 0x159   : > { %v5148_v7 = vpop.eup %4130  ;;  %v3738_v18 = vmul.f32 -1.442695, %v1671_v35  ;;  %v2243_v33 = vadd.f32 1.0, %v4129_v58 }
 0x15a   : > { %4150 = vpow2.f32 %v3727_v1  ;;  %v5153_v9 = vpop.eup %4132  ;;  %v2976_v1 = vrot.slane %v5148_v7, %v4801_v29 }
 0x15b   : > { %4152 = vrcp.f32 %v2247_v2  ;;  %v1674_v21 = vpop.xlane.xlu1 %1673  ;;  %3333 = vxpose.xlu0.b32.cont [6/16] (narrow) %v5094_v11, 8  ;;  %v4135_v26 = vpop.eup %4134  ;;  %v2936_v11 = vrot.slane %v5075_v46, %v4801_v29  ;;  %v2964_v46 = vrot.slane %v5142_v61, %v4801_v29  ;;  %v2972_v63 = vrot.slane %v5153_v9, %v4801_v29 }
 0x15c   : > { %v1656_v13 = vpop.xlane.xlu0 %1655  ;;  %4154 = vpow2.f32 %v3732_v62  ;;  %v3739_v15 = vmul.f32 -1.442695, %v1674_v21  ;;  %v4137_v43 = vpop.eup %4136  ;;  %v2244_v20 = vadd.f32 1.0, %v4135_v26 }
 0x15d   : > { %4156 = vrcp.f32 %v2249_v3  ;;  %v3733_v19 = vmul.f32 -1.442695, %v1656_v13  ;;  %v5165_v0 = vpop.eup %4138  ;;  %v2250_v51 = vadd.f32 1.0, %v4137_v43  ;;  %v3255_v12 = vsel %vm3205_vm7, %v2936_v11, %v3254_v38 }
 0x15e   : > { %4158 = vpow2.f32 %v3738_v18  ;;  %v5170_v30 = vpop.eup %4140  ;;  %v3261_v45 = vsel %vm3203_vm6, %v2964_v46, %v3260_v28  ;;  %v2984_v9 = vrot.slane %v5165_v0, %v4801_v29  ;;  %v3263_v14 = vsel %vm3193_vm1, %v2976_v1, %v2972_v63 }
 0x15f   : > { %4160 = vpow2.f32 %v3739_v15  ;;  %v1692_v40 = vpop.xlane.xlu1 %1691  ;;  %3334 = vxpose.xlu0.b32.cont [7/16] (narrow) %v3248_v16, 8  ;;  %v4143_v36 = vpop.eup %4142  ;;  %v3262_v56 = vsel %vm3205_vm7, %v2968_v41, %v3261_v45  ;;  %v2980_v4 = vrot.slane %v5170_v30, %v4801_v29 }
 0x160   : > { %v1689_v32 = vpop.xlane.xlu0 %1688  ;;  %4162 = vrcp.f32 %v2243_v33  ;;  %v3745_v37 = vmul.f32 -1.442695, %v1692_v40  ;;  %v5176_v60 = vpop.eup %4144  ;;  %v2256_v52 = vadd.f32 1.0, %v4143_v36 }
 0x161   : > { %4164 = vpow2.f32 %v3733_v19  ;;  %v3744_v39 = vmul.f32 -1.442695, %v1689_v32  ;;  %v4147_v54 = vpop.eup %4146  ;;  %v3264_v16 = vsel %vm3195_vm2, %v2980_v4, %v3263_v14 }
 0x162   : > { %4166 = vrcp.f32 %v2244_v20  ;;  %v4149_v42 = vpop.eup %4148  ;;  %v2255_v5 = vadd.f32 1.0, %v4147_v54  ;;  %v3265_v32 = vsel %vm3197_vm3, %v2984_v9, %v3264_v16 }
 0x163   : > { %4168 = vpow2.f32 %v3745_v37  ;;  %v1677_v44 = vpop.xlane.xlu1 %1676  ;;  %3335 = vxpose.xlu0.b32.cont [8/16] (narrow) %v3255_v12, 8  ;;  %v2245_v17 = vadd.f32 1.0, %v4149_v42 }
 0x164   : > { %v1659_v31 = vpop.xlane.xlu0 %1658  ;;  %v4151_v50 = vpop.eup %4150  ;;  %4170 = vrcp.f32 %v2250_v51  ;;  %v3740_v2 = vmul.f32 -1.442695, %v1677_v44 }
 0x165   : > { %v5183_v53 = vpop.eup %4152  ;;  %v2246_v49 = vadd.f32 1.0, %v4151_v50  ;;  %4172 = vpow2.f32 %v3744_v39  ;;  %v3734_v55 = vmul.f32 -1.442695, %v1659_v31 }
 0x166   : > { %v4155_v48 = vpop.eup %4154  ;;  %4174 = vrcp.f32 %v2245_v17  ;;  %v3004_v1 = vrot.slane %v5183_v53, %v4801_v29 }
 0x167   : > { %v5186_v57 = vpop.eup %4156  ;;  %4176 = vrcp.f32 %v2246_v49  ;;  %v1662_v59 = vpop.xlane.xlu1 %1661  ;;  %3336 = vxpose.xlu0.b32.cont [9/16] (narrow) %v3262_v56, 8  ;;  %v2251_v58 = vadd.f32 1.0, %v4155_v48 }
 0x168   : > { %v1695_v35 = vpop.xlane.xlu0 %1694  ;;  %v4159_v47 = vpop.eup %4158  ;;  %4178 = vrcp.f32 %v2256_v52  ;;  %v3735_v61 = vmul.f32 -1.442695, %v1662_v59 }
 0x169   : > { %v4161_v62 = vpop.eup %4160  ;;  %4180 = vpow2.f32 %v3734_v55  ;;  %v3746_v6 = vmul.f32 -1.442695, %v1695_v35  ;;  %v2257_v8 = vadd.f32 1.0, %v4159_v47 }
 0x16a   : > { %v4163_v3 = vpop.eup %4162  ;;  %4182 = vrcp.f32 %v2255_v5  ;;  %v2258_v25 = vadd.f32 1.0, %v4161_v62  ;;  %v3008_v62 = vrot.slane %v5176_v60, %v4801_v29 }
 0x16b   : > { %v4165_v18 = vpop.eup %4164  ;;  %4184 = vpow2.f32 %v3740_v2  ;;  %v1698_v10 = vpop.xlane.xlu1 %1697  ;;  %v2988_v15 = vrot.slane %v4163_v3, %v4801_v29 }
 0x16c   : > { %v1680_v21 = vpop.xlane.xlu0 %1679  ;;  %v4167_v13 = vpop.eup %4166  ;;  %4186 = vpow2.f32 %v3735_v61  ;;  %v2252_v23 = vadd.f32 1.0, %v4165_v18  ;;  %v3747_v19 = vmul.f32 -1.442695, %v1698_v10  ;;  %v3270_v9 = vsel %vm3193_vm1, %v3008_v62, %v3004_v1 }
 0x16d   : > { %v4169_v7 = vpop.eup %4168  ;;  %4188 = vrcp.f32 %v2251_v58  ;;  %v3741_v33 = vmul.f32 -1.442695, %v1680_v21  ;;  %v2992_v20 = vrot.slane %v4167_v13, %v4801_v29  ;;  %v3266_v34 = vsel %vm3199_vm4, %v2988_v15, %v3265_v32 }
 0x16e   : > { %v5197_v26 = vpop.eup %4170  ;;  %4190 = vpow2.f32 %v3746_v6  ;;  %v2264_v0 = vadd.f32 1.0, %v4169_v7 }
 0x16f   : > { %v4173_v43 = vpop.eup %4172  ;;  %4192 = vrcp.f32 %v2257_v8  ;;  %v1716_v11 = vpop.xlane.xlu1 %1715  ;;  %v3267_v54 = vsel %vm3201_vm5, %v2992_v20, %v3266_v34  ;;  %v3012_v8 = vrot.slane %v5186_v57, %v4801_v29  ;;  %v3016_v53 = vrot.slane %v5197_v26, %v4801_v29 }
 0x170   : > { %v1713_v22 = vpop.xlane.xlu0 %1712  ;;  %v4175_v24 = vpop.eup %4174  ;;  %4194 = vrcp.f32 %v2258_v25  ;;  %v3753_v30 = vmul.f32 -1.442695, %v1716_v11  ;;  %v2263_v51 = vadd.f32 1.0, %v4173_v43 }
 0x171   : > { %v4177_v27 = vpop.eup %4176  ;;  %4196 = vrcp.f32 %v2252_v23  ;;  %v2996_v40 = vrot.slane %v4175_v24, %v4801_v29  ;;  %v3752_v50 = vmul.f32 -1.442695, %v1713_v22  ;;  %v3271_v26 = vsel %vm3195_vm2, %v3012_v8, %v3270_v9 }
 0x172   : > { %v5204_v38 = vpop.eup %4178  ;;  %4198 = vpow2.f32 %v3741_v33  ;;  %v3000_v46 = vrot.slane %v4177_v27, %v4801_v29  ;;  %v3272_v22 = vsel %vm3197_vm3, %v3016_v53, %v3271_v26 }
 0x173   : > { %v4181_v36 = vpop.eup %4180  ;;  %4200 = vpow2.f32 %v3747_v19  ;;  %v1701_v37 = vpop.xlane.xlu1 %1700  ;;  %v3268_v42 = vsel %vm3203_vm6, %v2996_v40, %v3267_v54 }
 0x174   : > { %v1683_v39 = vpop.xlane.xlu0 %1682  ;;  %v5209_v12 = vpop.eup %4182  ;;  %4202 = vrcp.f32 %v2264_v0  ;;  %v2253_v41 = vadd.f32 1.0, %v4181_v36  ;;  %v3269_v31 = vsel %vm3205_vm7, %v3000_v46, %v3268_v42  ;;  %v3748_v59 = vmul.f32 -1.442695, %v1701_v37 }
 0x175   : > { %v3742_v28 = vmul.f32 -1.442695, %v1683_v39  ;;  %v4185_v44 = vpop.eup %4184  ;;  %4204 = vpow2.f32 %v3753_v30  ;;  %3337 = vxpose.xlu0.b32.cont [10/16] (narrow) %v3269_v31, 8 }
 0x176   : > { %v4187_v45 = vpop.eup %4186  ;;  %4206 = vrcp.f32 %v2253_v41  ;;  %v2259_v5 = vadd.f32 1.0, %v4185_v44 }
 0x177   : > { %v4189_v52 = vpop.eup %4188  ;;  %4208 = vrcp.f32 %v2263_v51  ;;  %v2254_v17 = vadd.f32 1.0, %v4187_v45  ;;  %v1686_v49 = vpop.xlane.xlu1 %1685 }
 0x178   : > { %v1719_v55 = vpop.xlane.xlu0 %1718  ;;  %v4191_v48 = vpop.eup %4190  ;;  %4210 = vpow2.f32 %v3742_v28  ;;  %v3743_v56 = vmul.f32 -1.442695, %v1686_v49  ;;  %v3020_v23 = vrot.slane %v4189_v52, %v4801_v29 }
 0x179   : > { %v5213_v2 = vpop.eup %4192  ;;  %4212 = vrcp.f32 %v2254_v17  ;;  %v3754_v47 = vmul.f32 -1.442695, %v1719_v55  ;;  %v2265_v63 = vadd.f32 1.0, %v4191_v48 }
 0x17a   : > { %v5215_v35 = vpop.eup %4194  ;;  %4214 = vpow2.f32 %v3752_v50  ;;  %v3273_v40 = vsel %vm3199_vm4, %v3020_v23, %v3272_v22 }
 0x17b   : > { %v4197_v61 = vpop.eup %4196  ;;  %4216 = vpow2.f32 %v3743_v56  ;;  %v1722_v58 = vpop.xlane.xlu1 %1721  ;;  %v3040_v56 = vrot.slane %v5204_v38, %v4801_v29 }
 0x17c   : > { %v1704_v3 = vpop.xlane.xlu0 %1703  ;;  %v4199_v4 = vpop.eup %4198  ;;  %4218 = vrcp.f32 %v2259_v5  ;;  %v3755_v6 = vmul.f32 -1.442695, %v1722_v58  ;;  %v3024_v15 = vrot.slane %v4197_v61, %v4801_v29 }
 0x17d   : > { %v4201_v18 = vpop.eup %4200  ;;  %v2260_v10 = vadd.f32 1.0, %v4199_v4  ;;  %4220 = vpow2.f32 %v3748_v59  ;;  %v3749_v60 = vmul.f32 -1.442695, %v1704_v3  ;;  %v3036_v59 = vrot.slane %v5209_v12, %v4801_v29 }
 0x17e   : > { %v5223_v21 = vpop.eup %4202  ;;  %4222 = vpow2.f32 %v3754_v47  ;;  %v2266_v33 = vadd.f32 1.0, %v4201_v18  ;;  %v3274_v34 = vsel %vm3201_vm5, %v3024_v15, %v3273_v40 }
 0x17f   : > { %v4205_v13 = vpop.eup %4204  ;;  %4224 = vrcp.f32 %v2265_v63  ;;  %v1740_v25 = vpop.xlane.xlu1 %1739  ;;  %v3044_v63 = vrot.slane %v5213_v2, %v4801_v29 }
 0x180   : > { %v1737_v7 = vpop.xlane.xlu0 %1736  ;;  %v4207_v14 = vpop.eup %4206  ;;  %4226 = vpow2.f32 %v3755_v6  ;;  %v3761_v57 = vmul.f32 -1.442695, %v1740_v25  ;;  %v2272_v24 = vadd.f32 1.0, %v4205_v13  ;;  %v3048_v6 = vrot.slane %v5215_v35, %v4801_v29 }
 0x181   : > { %v5230_v16 = vpop.eup %4208  ;;  %4228 = vrcp.f32 %v2260_v10  ;;  %v3028_v43 = vrot.slane %v4207_v14, %v4801_v29  ;;  %v3760_v11 = vmul.f32 -1.442695, %v1737_v7  ;;  %v3277_v13 = vsel %vm3193_vm1, %v3040_v56, %v3036_v59 }
 0x182   : > { %v4211_v19 = vpop.eup %4210  ;;  %4230 = vpow2.f32 %v3749_v60  ;;  %v3278_v23 = vsel %vm3195_vm2, %v3044_v63, %v3277_v13 }
 0x183   : > { %v4213_v20 = vpop.eup %4212  ;;  %v2261_v0 = vadd.f32 1.0, %v4211_v19  ;;  %4232 = vpow2.f32 %v3761_v57  ;;  %v1725_v27 = vpop.xlane.xlu1 %1724  ;;  %v3275_v37 = vsel %vm3203_vm6, %v3028_v43, %v3274_v34 }
 0x184   : > { %v1707_v30 = vpop.xlane.xlu0 %1706  ;;  %v4215_v32 = vpop.eup %4214  ;;  %4234 = vrcp.f32 %v2266_v33  ;;  %v3032_v46 = vrot.slane %v4213_v20, %v4801_v29  ;;  %v3756_v51 = vmul.f32 -1.442695, %v1725_v27  ;;  %v3279_v33 = vsel %vm3197_vm3, %v3048_v6, %v3278_v23 }
 0x185   : > { %v4217_v36 = vpop.eup %4216  ;;  %4236 = vrcp.f32 %v2261_v0  ;;  %v3750_v41 = vmul.f32 -1.442695, %v1707_v30  ;;  %v2271_v44 = vadd.f32 1.0, %v4215_v32 }
 0x186   : > { %v4219_v39 = vpop.eup %4218  ;;  %v2262_v54 = vadd.f32 1.0, %v4217_v36  ;;  %4238 = vpow2.f32 %v3760_v11  ;;  %v3276_v28 = vsel %vm3205_vm7, %v3032_v46, %v3275_v37 }
 0x187   : > { %v4221_v42 = vpop.eup %4220  ;;  %4240 = vrcp.f32 %v2272_v24  ;;  %3338 = vxpose.xlu0.b32.cont [11/16] (narrow) %v3276_v28, 8  ;;  %v1710_v31 = vpop.xlane.xlu1 %1709  ;;  %v3052_v18 = vrot.slane %v4219_v39, %v4801_v29 }
 0x188   : > { %v1743_v45 = vpop.xlane.xlu0 %1742  ;;  %v4223_v50 = vpop.eup %4222  ;;  %4242 = vrcp.f32 %v2262_v54  ;;  %v3751_v52 = vmul.f32 -1.442695, %v1710_v31  ;;  %v2267_v48 = vadd.f32 1.0, %v4221_v42 }
 0x189   : > { %v5240_v17 = vpop.eup %4224  ;;  %4244 = vpow2.f32 %v3756_v51  ;;  %v3762_v49 = vmul.f32 -1.442695, %v1743_v45  ;;  %v2273_v47 = vadd.f32 1.0, %v4223_v50  ;;  %v3280_v43 = vsel %vm3199_vm4, %v3052_v18, %v3279_v33 }
 0x18a   : > { %v4227_v55 = vpop.eup %4226  ;;  %4246 = vpow2.f32 %v3750_v41  ;;  %v3076_v59 = vrot.slane %v5240_v17, %v4801_v29 }
 0x18b   : > { %v4229_v5 = vpop.eup %4228  ;;  %4248 = vrcp.f32 %v2271_v44  ;;  %v1746_v61 = vpop.xlane.xlu1 %1745  ;;  %v2274_v10 = vadd.f32 1.0, %v4227_v55 }
 0x18c   : > { %v1728_v62 = vpop.xlane.xlu0 %1727  ;;  %v4231_v1 = vpop.eup %4230  ;;  %4250 = vpow2.f32 %v3751_v52  ;;  %v3763_v58 = vmul.f32 -1.442695, %v1746_v61  ;;  %v3056_v2 = vrot.slane %v4229_v5, %v4801_v29  ;;  %v3072_v52 = vrot.slane %v5223_v21, %v4801_v29 }
 0x18d   : > { %v4233_v3 = vpop.eup %4232  ;;  %v2268_v4 = vadd.f32 1.0, %v4231_v1  ;;  %4252 = vpow2.f32 %v3762_v49  ;;  %v3757_v12 = vmul.f32 -1.442695, %v1728_v62  ;;  %v3068_v49 = vrot.slane %v5230_v16, %v4801_v29 }
 0x18e   : > { %v5250_v38 = vpop.eup %4234  ;;  %4254 = vrcp.f32 %v2267_v48  ;;  %v2280_v7 = vadd.f32 1.0, %v4233_v3  ;;  %v3281_v20 = vsel %vm3201_vm5, %v3056_v2, %v3280_v43 }
 0x18f   : > { %v4237_v8 = vpop.eup %4236  ;;  %4256 = vrcp.f32 %v2273_v47  ;;  %v1764_v60 = vpop.xlane.xlu1 %1763  ;;  %v3080_v21 = vrot.slane %v5250_v38, %v4801_v29 }
 0x190   : > { %v1761_v53 = vpop.xlane.xlu0 %1760  ;;  %v4239_v25 = vpop.eup %4238  ;;  %4258 = vpow2.f32 %v3763_v58  ;;  %v3060_v35 = vrot.slane %v4237_v8, %v4801_v29  ;;  %v3769_v14 = vmul.f32 -1.442695, %v1764_v60 }
 0x191   : > { %v5257_v9 = vpop.eup %4240  ;;  %4260 = vrcp.f32 %v2268_v4  ;;  %v2279_v15 = vadd.f32 1.0, %v4239_v25  ;;  %v3768_v37 = vmul.f32 -1.442695, %v1761_v53 }
 0x192   : > { %v4243_v57 = vpop.eup %4242  ;;  %4262 = vpow2.f32 %v3757_v12  ;;  %v3282_v27 = vsel %vm3203_vm6, %v3060_v35, %v3281_v20  ;;  %v3284_v12 = vsel %vm3193_vm1, %v3072_v52, %v3068_v49 }
 0x193   : > { %v4245_v26 = vpop.eup %4244  ;;  %4264 = vrcp.f32 %v2274_v10  ;;  %v1749_v19 = vpop.xlane.xlu1 %1748  ;;  %v3064_v22 = vrot.slane %v4243_v57, %v4801_v29  ;;  %v3285_v38 = vsel %vm3195_vm2, %v3076_v59, %v3284_v12 }
 0x194   : > { %v1731_v11 = vpop.xlane.xlu0 %1730  ;;  %v4247_v24 = vpop.eup %4246  ;;  %4266 = vrcp.f32 %v2280_v7  ;;  %v2275_v34 = vadd.f32 1.0, %v4245_v26  ;;  %v3764_v44 = vmul.f32 -1.442695, %v1749_v19  ;;  %v3286_v60 = vsel %vm3197_vm3, %v3080_v21, %v3285_v38 }
 0x195   : > { %v3758_v0 = vmul.f32 -1.442695, %v1731_v11  ;;  %v5264_v30 = vpop.eup %4248  ;;  %v2269_v40 = vadd.f32 1.0, %v4247_v24  ;;  %4268 = vpow2.f32 %v3769_v14  ;;  %v3283_v32 = vsel %vm3205_vm7, %v3064_v22, %v3282_v27 }
 0x196   : > { %v4251_v46 = vpop.eup %4250  ;;  %4270 = vrcp.f32 %v2279_v15  ;;  %3339 = vxpose.xlu0.b32.cont [12/16] (narrow) %v3283_v32, 8 }
 0x197   : > { %v4253_v36 = vpop.eup %4252  ;;  %4272 = vrcp.f32 %v2269_v40  ;;  %v2270_v51 = vadd.f32 1.0, %v4251_v46  ;;  %v1734_v39 = vpop.xlane.xlu1 %1733 }
 0x198   : > { %v1767_v54 = vpop.xlane.xlu0 %1766  ;;  %v4255_v41 = vpop.eup %4254  ;;  %4274 = vpow2.f32 %v3758_v0  ;;  %v3759_v28 = vmul.f32 -1.442695, %v1734_v39  ;;  %v2281_v45 = vadd.f32 1.0, %v4253_v36 }
 0x199   : > { %v5267_v42 = vpop.eup %4256  ;;  %4276 = vrcp.f32 %v2270_v51  ;;  %v3770_v55 = vmul.f32 -1.442695, %v1767_v54  ;;  %v3084_v63 = vrot.slane %v4255_v41, %v4801_v29 }
 0x19a   : > { %v4259_v31 = vpop.eup %4258  ;;  %4278 = vrcp.f32 %v2275_v34  ;;  %v3108_v49 = vrot.slane %v5267_v42, %v4801_v29 }
 0x19b   : > { %v4261_v50 = vpop.eup %4260  ;;  %4280 = vpow2.f32 %v3768_v37  ;;  %v1770_v48 = vpop.xlane.xlu1 %1769  ;;  %v2282_v16 = vadd.f32 1.0, %v4259_v31  ;;  %v3287_v25 = vsel %vm3199_vm4, %v3084_v63, %v3286_v60  ;;  %v3100_v31 = vrot.slane %v5264_v30, %v4801_v29 }
 0x19c   : > { %v1752_v5 = vpop.xlane.xlu0 %1751  ;;  %v4263_v56 = vpop.eup %4262  ;;  %4282 = vpow2.f32 %v3759_v28  ;;  %v3771_v47 = vmul.f32 -1.442695, %v1770_v48  ;;  %v3088_v6 = vrot.slane %v4261_v50, %v4801_v29  ;;  %v3104_v28 = vrot.slane %v5257_v9, %v4801_v29 }
 0x19d   : > { %v5275_v61 = vpop.eup %4264  ;;  %4284 = vpow2.f32 %v3764_v44  ;;  %v3765_v62 = vmul.f32 -1.442695, %v1752_v5  ;;  %v2276_v3 = vadd.f32 1.0, %v4263_v56 }
 0x19e   : > { %v5279_v1 = vpop.eup %4266  ;;  %4286 = vrcp.f32 %v2281_v45  ;;  %v3288_v33 = vsel %vm3201_vm5, %v3088_v6, %v3287_v25  ;;  %v3112_v9 = vrot.slane %v5275_v61, %v4801_v29 }
 0x19f   : > { %v4269_v58 = vpop.eup %4268  ;;  %4288 = vpow2.f32 %v3770_v55  ;;  %v1773_v4 = vpop.xlane.xlu1 %1772 }
 0x1a0   : > { %v1755_v17 = vpop.xlane.xlu0 %1754  ;;  %v5284_v18 = vpop.eup %4270  ;;  %4290 = vpow2.f32 %v3771_v47  ;;  %v3772_v8 = vmul.f32 -1.442695, %v1773_v4  ;;  %v2288_v20 = vadd.f32 1.0, %v4269_v58 }
 0x1a1   : > { %v4273_v10 = vpop.eup %4272  ;;  %4292 = vpow2.f32 %v3765_v62  ;;  %v3766_v2 = vmul.f32 -1.442695, %v1755_v17  ;;  %v3291_v62 = vsel %vm3193_vm1, %v3104_v28, %v3100_v31 }
 0x1a2   : > { %v4275_v53 = vpop.eup %4274  ;;  %4294 = vrcp.f32 %v2282_v16  ;;  %v3092_v13 = vrot.slane %v4273_v10, %v4801_v29  ;;  %v3292_v63 = vsel %vm3195_vm2, %v3108_v49, %v3291_v62 }
 0x1a3   : > { %v4277_v7 = vpop.eup %4276  ;;  %4296 = vrcp.f32 %v2276_v3  ;;  %v2277_v35 = vadd.f32 1.0, %v4275_v53  ;;  %v1776_v23 = vpop.xlane.xlu1 %1775  ;;  %v3293_v3 = vsel %vm3197_vm3, %v3112_v9, %v3292_v63 }
 0x1a4   : > { %v1758_v14 = vpop.xlane.xlu0 %1757  ;;  %v5291_v57 = vpop.eup %4278  ;;  %4298 = vpow2.f32 %v3772_v8  ;;  %v3773_v15 = vmul.f32 -1.442695, %v1776_v23  ;;  %v3096_v26 = vrot.slane %v4277_v7, %v4801_v29  ;;  %v3289_v11 = vsel %vm3203_vm6, %v3092_v13, %v3288_v33 }
 0x1a5   : > { %v3767_v43 = vmul.f32 -1.442695, %v1758_v14  ;;  %v4281_v19 = vpop.eup %4280  ;;  %4300 = vrcp.f32 %v2277_v35  ;;  %v3116_v30 = vrot.slane %v5291_v57, %v4801_v29  ;;  %v3136_v23 = vrot.slane %v5279_v1, %v4801_v29 }
 0x1a6   : > { %v4283_v22 = vpop.eup %4282  ;;  %4302 = vpow2.f32 %v3766_v2  ;;  %v3290_v24 = vsel %vm3205_vm7, %v3096_v26, %v3289_v11  ;;  %v2287_v37 = vadd.f32 1.0, %v4281_v19  ;;  %v3132_v14 = vrot.slane %v5284_v18, %v4801_v29 }
 0x1a7   : > { %v4285_v0 = vpop.eup %4284  ;;  %v2278_v27 = vadd.f32 1.0, %v4283_v22  ;;  %4304 = vpow2.f32 %v3773_v15  ;;  %3340 = vxpose.xlu0.b32.cont [13/16] (narrow) %v3290_v24, 8  ;;  %v1782_v32 = vpop.xlane.xlu1 %1781  ;;  %v3294_v6 = vsel %vm3199_vm4, %v3116_v30, %v3293_v3 }
 0x1a8   : > { %v1779_v40 = vpop.xlane.xlu0 %1778  ;;  %v5296_v46 = vpop.eup %4286  ;;  %4306 = vpow2.f32 %v3767_v43  ;;  %v3775_v36 = vmul.f32 -1.442695, %v1782_v32  ;;  %v2283_v54 = vadd.f32 1.0, %v4285_v0 }
 0x1a9   : > { %v3774_v34 = vmul.f32 -1.442695, %v1779_v40  ;;  %v4289_v51 = vpop.eup %4288  ;;  %4308 = vrcp.f32 %v2278_v27  ;;  %v3140_v57 = vrot.slane %v5296_v46, %v4801_v29 }
 0x1aa   : > { %v4291_v39 = vpop.eup %4290  ;;  %4310 = vrcp.f32 %v2288_v20  ;;  %v2289_v45 = vadd.f32 1.0, %v4289_v51  ;;  %v3298_v20 = vsel %vm3193_vm1, %v3136_v23, %v3132_v14 }
 0x1ab   : > { %v4293_v41 = vpop.eup %4292  ;;  %4312 = vpow2.f32 %v3774_v34  ;;  %v2290_v55 = vadd.f32 1.0, %v4291_v39  ;;  %v3299_v27 = vsel %vm3195_vm2, %v3140_v57, %v3298_v20 }
 0x1ac   : > { %v5300_v44 = vpop.eup %4294  ;;  %v2284_v50 = vadd.f32 1.0, %v4293_v41  ;;  %4314 = vpow2.f32 %v3775_v36 }
 0x1ad   : > { %v4297_v52 = vpop.eup %4296  ;;  %4316 = vrcp.f32 %v2287_v37  ;;  %v3144_v43 = vrot.slane %v5300_v44, %v4801_v29 }
 0x1ae   : > { %v4299_v48 = vpop.eup %4298  ;;  %4318 = vrcp.f32 %v2283_v54  ;;  %v3120_v47 = vrot.slane %v4297_v52, %v4801_v29 }
 0x1af   : > { %v4301_v5 = vpop.eup %4300  ;;  %4320 = vrcp.f32 %v2284_v50  ;;  %v2291_v56 = vadd.f32 1.0, %v4299_v48  ;;  %v3300_v46 = vsel %vm3197_vm3, %v3144_v43, %v3299_v27 }
 0x1b0   : > { %v4303_v59 = vpop.eup %4302  ;;  %4322 = vrcp.f32 %v2289_v45  ;;  %v3124_v16 = vrot.slane %v4301_v5, %v4801_v29  ;;  %v3295_v38 = vsel %vm3201_vm5, %v3120_v47, %v3294_v6 }
 0x1b1   : > { %v4305_v42 = vpop.eup %4304  ;;  %4324 = vrcp.f32 %v2290_v55  ;;  %v2285_v21 = vadd.f32 1.0, %v4303_v59 }
 0x1b2   : > { %v4307_v61 = vpop.eup %4306  ;;  %4326 = vrcp.f32 %v2291_v56  ;;  %v2292_v58 = vadd.f32 1.0, %v4305_v42  ;;  %v3296_v60 = vsel %vm3203_vm6, %v3124_v16, %v3295_v38  ;;  %v3369_v42 = vld [vmem:[%s5377_s6] sm:$0x1] }
 0x1b3   : > { %v4309_v4 = vpop.eup %4308  ;;  %4328 = vrcp.f32 %v2285_v21  ;;  %v2286_v17 = vadd.f32 1.0, %v4307_v61 }
 0x1b4   : > { %v4311_v12 = vpop.eup %4310  ;;  %4330 = vrcp.f32 %v2292_v58  ;;  %v3128_v8 = vrot.slane %v4309_v4, %v4801_v29 }
 0x1b5   : > { %v4313_v10 = vpop.eup %4312  ;;  %4332 = vrcp.f32 %v2286_v17  ;;  %v3168_v22 = vrot.slane %v4311_v12, %v4801_v29 }
 0x1b6   : > { %v4315_v53 = vpop.eup %4314  ;;  %v2293_v2 = vadd.f32 1.0, %v4313_v10  ;;  %v3297_v13 = vsel %vm3205_vm7, %v3128_v8, %v3296_v60 }
 0x1b7   : > { %v4317_v25 = vpop.eup %4316  ;;  %v2294_v7 = vadd.f32 1.0, %v4315_v53  ;;  %3341 = vxpose.xlu0.b32.cont [14/16] (narrow) %v3297_v13, 8 }
 0x1b8   : > { %v4319_v35 = vpop.eup %4318  ;;  %4334 = vrcp.f32 %v2293_v2  ;;  %v3164_v1 = vrot.slane %v4317_v25, %v4801_v29 }
 0x1b9   : > { %v4321_v33 = vpop.eup %4320  ;;  %4336 = vrcp.f32 %v2294_v7  ;;  %v3148_v19 = vrot.slane %v4319_v35, %v4801_v29 }
 0x1ba   : > { %v4323_v15 = vpop.eup %4322  ;;  %v3152_v18 = vrot.slane %v4321_v33, %v4801_v29  ;;  %v3305_v28 = vsel %vm3193_vm1, %v3168_v22, %v3164_v1 }
 0x1bb   : > { %v4325_v26 = vpop.eup %4324  ;;  %v3172_v0 = vrot.slane %v4323_v15, %v4801_v29  ;;  %v3301_v51 = vsel %vm3199_vm4, %v3148_v19, %v3300_v46 }
 0x1bc   : > { %v4327_v11 = vpop.eup %4326  ;;  %v3176_v34 = vrot.slane %v4325_v26, %v4801_v29  ;;  %v3302_v54 = vsel %vm3201_vm5, %v3152_v18, %v3301_v51 }
 0x1bd   : > { %v4329_v24 = vpop.eup %4328  ;;  %v3180_v37 = vrot.slane %v4327_v11, %v4801_v29  ;;  %v3306_v31 = vsel %vm3195_vm2, %v3172_v0, %v3305_v28 }
 0x1be   : > { %v4331_v40 = vpop.eup %4330  ;;  %v3156_v32 = vrot.slane %v4329_v24, %v4801_v29  ;;  %v3307_v52 = vsel %vm3197_vm3, %v3176_v34, %v3306_v31 }
 0x1bf   : > { %v4333_v36 = vpop.eup %4332  ;;  %v3184_v41 = vrot.slane %v4331_v40, %v4801_v29  ;;  %v3308_v48 = vsel %vm3199_vm4, %v3180_v37, %v3307_v52 }
 0x1c0   : > { %v3160_v39 = vrot.slane %v4333_v36, %v4801_v29  ;;  %v3303_v44 = vsel %vm3203_vm6, %v3156_v32, %v3302_v54 }
 0x1c1   : > { %v3309_v5 = vsel %vm3201_vm5, %v3184_v41, %v3308_v48 }
 0x1c2   : > { %v4335_v45 = vpop.eup %4334  ;;  %v3304_v50 = vsel %vm3205_vm7, %v3160_v39, %v3303_v44 }
 0x1c3   : > { %v4337_v49 = vpop.eup %4336  ;;  %3342 = vxpose.xlu0.b32.cont [15/16] (narrow) %v3304_v50, 8  ;;  %v3188_v55 = vrot.slane %v4335_v45, %v4801_v29 }
 0x1c4   : > { %v3192_v9 = vrot.slane %v4337_v49, %v4801_v29  ;;  %v3361_v29 = vld [vmem:[%s243_s20] sm:$0x3] }
 0x1c5   : > { %v3310_v56 = vsel %vm3203_vm6, %v3188_v55, %v3309_v5 }
 0x1c6   : > { %v3311_v30 = vsel %vm3205_vm7, %v3192_v9, %v3310_v56 }
 0x1c7   : > { %3343 = vxpose.xlu0.b32.end [16/16] (narrow) %v3311_v30, 8 }
 0x20b   : > { %v3344_v59 = vpop.trf.xlu0 }
 0x20c   : > { %3360 = vst [vmem:[%s222_s22] sm:$0x3] %v3344_v59  ;;  %vm3362_vm11 = vcmp.gt.f32.partialorder %v3344_v59, %v3361_v29 }
 0x20d   : > { %vm5380_vm12 = vmpackc.low %vm3362_vm11, %vm3362_vm11 }
 0x20e   : > { %4351 = shalt.err (!%p4348_p4)
}
 0x20f   : > { %s4352_s14 = scalar_lea.hbm %s5369_s30, 32  ;;  %s4356_s27 = scalar_lea.hbm %s5466_s3, 64 }
 0x210   : > { %p4353_p7 = scmp.ne.s32.totalorder %s5369_s30, %s4352_s14  ;;  %p4357_p10 = scmp.lt.u32.totalorder %s5369_s30, %s5466_s3 }
 0x211   : > { %p4358_p11 = scmp.lt.u32.totalorder %s4356_s27, %s4352_s14  ;;  %p4360_p13 = scmp.lt.u32.totalorder %s4352_s14, %s5369_s30 }
 0x212   : > { %p4354_p8 = pnand %p4353_p7, %p4500_p5 }
 0x213   : > { %p4359_p12 = por %p4358_p11, %p4357_p10 }
 0x214   : > { %p4355_p9 = pneg %p4354_p8 }
 0x215   : > { %p4361_p0 = por %p4360_p13, %p4359_p12 }
 0x217   : > { %p4362_p1 = pnand %p4361_p0, %p4355_p9 }
 0x219   : > { %4365 = shalt.err (!%p4362_p1)
}
 0x21a   : > { %3781 = dma.vmem_to_hbm [thread:$0]  (%p4500_p5), %s5364_s23, 32, %s5369_s30, %s3373_s8   ;;  %vm3364_vm13 = vmpackc.even %vm5380_vm12, %vm5380_vm12  ;;  %v4435_v21 = vmov 0  }
 0x21b   : > { %v3365_v16 = vsel %vm3364_vm13, 16843009, %v4435_v21  ;;  %s5415_s12 = scalar_lea.hbm %s5467_s4, %s3778_s5  ;;  %s3378_s23 = scalar_lea.sflag [#allocation5], %s5357_s10 }
 0x21c   : > { %v3370_v63 = vsel %vm5371_vm10, %v3365_v16, %v3369_v42  ;;  %s4366_s30 = scalar_lea.vmem %s5419_s7, 16  ;;  %s4436_s19 = smov [#allocation4]  }
 0x21d   : > { %3371 = vst [vmem:[%s5377_s6] sm:$0x1] %v3370_v63  ;;  %p4367_p2 = scmp.ne.s32.totalorder %s5419_s7, %s4366_s30  ;;  %s4370_s8 = sshll.u32 %s4436_s19, 4  ;;  %s4371_s8 = int_to_ptr.vmem [resolvable:$false] %s4370_s8 }
 0x21e   : > { %s4372_s5 = scalar_lea.vmem %s4371_s8, 32  ;;  %p4373_p7 = scmp.lt.s32.totalorder %s5419_s7, %s4371_s8 }
 0x21f   : > { %p4368_p3 = pnand %p4367_p2, %p4500_p5  ;;  %p4374_p8 = scmp.lt.s32.totalorder %s4372_s5, %s4366_s30 }
 0x221   : > { %p4369_p4 = pneg %p4368_p3  ;;  %p4375_p9 = por %p4374_p8, %p4373_p7 }
 0x223   : > { %p4376_p10 = pnand %p4375_p9, %p4369_p4 }
 0x225   : > { %4379 = shalt.err (!%p4376_p10)
}
 0x226   : > { %s4380_s10 = scalar_lea.hbm %s5415_s12, 16  ;;  %s4384_s14 = scalar_lea.hbm %s5467_s4, 32 }
 0x227   : > { %p4381_p11 = scmp.ne.s32.totalorder %s5415_s12, %s4380_s10  ;;  %p4385_p0 = scmp.lt.u32.totalorder %s5415_s12, %s5467_s4 }
 0x228   : > { %p4386_p1 = scmp.lt.u32.totalorder %s4384_s14, %s4380_s10  ;;  %p4388_p3 = scmp.lt.u32.totalorder %s4380_s10, %s5415_s12 }
 0x229   : > { %p4382_p12 = pnand %p4381_p11, %p4500_p5 }
 0x22a   : > { %p4387_p2 = por %p4386_p1, %p4385_p0 }
 0x22b   : > { %p4383_p13 = pneg %p4382_p12 }
 0x22c   : > { %p4389_p4 = por %p4388_p3, %p4387_p2 }
 0x22e   : > { %p4390_p7 = pnand %p4389_p4, %p4383_p13 }
 0x230   : > { %4393 = shalt.err (!%p4390_p7)
}
 0x231   : > { %3782 = dma.vmem_to_hbm [thread:$0]  (%p4500_p5), %s5419_s7, 16, %s5415_s12, %s3378_s23  }
 0x232 PF: > { %p3792_p8 = scmp.ge.s32.totalorder %s4432_s18, 2  ;;  %s3415_s27 = sand.u32 1, %s4420_s15  }
 0x233   : > { %s3416_s28 = scalar_lea.sflag [#allocation3], %s3415_s27 }
 0x234   : > { %p3786_p9 = pnand %p3792_p8, %p4504_p6 }
 0x236   : > { %4411 = dma.done.wait (!%p3786_p9), %s3416_s28, 32  }
 0x237   : > { %4413 = vsyncadd (!%p3786_p9), %s3416_s28, 4294967264  ;;  %s3425_s29 = scalar_lea.sflag [#allocation5], %s3415_s27 }
 0x238   : > { %4415 = dma.done.wait (!%p3786_p9), %s3425_s29, 16  }
 0x239   : > { %4417 = vsyncadd (!%p3786_p9), %s3425_s29, 4294967280  ;;  %p18_p5 = scmp.ge.s32.totalorder %s4487_s21, 4   ;;  %s5474_s15 = smov %s4424_s16 }
 0x23a   : > { %s5475_s16 = smov %s4428_s17  ;;  %s5476_s17 = smov %s4498_s24 }
 0x23b   : > { %s5477_s18 = smov %s4487_s21  ;;  %20 = sbr.rel (!%p18_p5) target bundleno = 5 (0x5), region = 90 }
 0x242   :  { %3429 = vsyncpa [#allocation3], 1 }
 0x243   :  { %3431 = vsyncpa [#allocation3 + $0x1], 1 }
 0x244   :  { %3432 = vsyncpa [#allocation5], 1 }
 0x245   :  { %3434 = vsyncpa [#allocation5 + $0x1], 1 }

</bundles_post_ra>
